<compile_context>
chip_gen: v5e
topology: v5e:2x2
jax: 0.10.0
libtpu: 0.0.40
codegen_flags: <defaults>
</compile_context>

<pallas_src>
import jax
import jax.numpy as jnp
from jax.experimental import pallas as pl
from jax.experimental.pallas import tpu as pltpu

_LANE = 128


def _round_up(v, m):
    return ((v + m - 1) // m) * m


def _predict_impl(x, conv_w, conv_b, cls_w, cls_b, block_n=8):
    """Forward pass. x: [N, C_in, H, W] float32 -> logits [N, num_classes]."""
    N, C_in, H, W = x.shape
    C_out, C_in2, KH, KW = conv_w.shape
    num_classes = cls_w.shape[0]
    assert C_in2 == C_in
    assert KH == KW and KH % 2 == 1, "stride-1 'same' conv with odd kernel only"

    pad = KH // 2
    Hp, Wp = H + 2 * pad, W + 2 * pad
    L = Hp * Wp                          # flattened padded spatial length
    KK = KH * KW
    # Flattened output length, incl. the 2*pad junk columns per row band.
    # The pool mask below zeroes exactly those junk columns -- keep these tied.
    Lout = (H - 1) * Wp + W
    assert Lout == H * Wp - 2 * pad

    Cp = _round_up(C_out, _LANE)         # lane-dense conv channels
    NCp = _round_up(num_classes, _LANE)  # lane-dense classes

    # Batch block: Bt images per grid step.  Bt==N (<8) or a multiple of 8 so
    # the (Bt, NCp) output block satisfies the (8,128) sublane/lane rule.
    Bt = block_n if N >= block_n else N
    N_pad = _round_up(N, Bt)
    # NOTE(v7x megacore): with many images N_pad//Bt >= 2 so "parallel" spreads
    # steps across both TensorCores; at toy N the grid is a single step.

    # ---- glue (plain JAX, no im2col): pad NCHW spatially, flatten H,W ----
    # Lane-dense layout: [N_pad, C_in, L] keeps L (>=128) on the lane axis.
    x_pad = jnp.pad(x, ((0, N_pad - N), (0, 0), (pad, pad), (pad, pad)))
    x_flat = x_pad.reshape(N_pad, C_in, L).astype(jnp.bfloat16)

    # Conv weight [C_out, C_in, KH, KW] -> [Cp, KK*C_in] with the K axis in
    # (ki, kj, ci) order to match the in-kernel tap concatenation order.
    w_all = jnp.transpose(conv_w, (0, 2, 3, 1)).reshape(C_out, KK * C_in)
    w_all = jnp.pad(w_all, ((0, Cp - C_out), (0, 0))).astype(jnp.bfloat16)
    b_conv = jnp.pad(conv_b, (0, Cp - C_out)).reshape(Cp, 1).astype(jnp.float32)

    # Classifier [num_classes, C_out] -> [Cp, NCp] (zero-pad), bias [1, NCp].
    # Kept f32: it is tiny, VMEM-resident, and preserves epilogue accuracy.
    w_cls = jnp.pad(cls_w.T, ((0, Cp - C_out), (0, NCp - num_classes))
                    ).astype(jnp.float32)
    b_cls = jnp.pad(cls_b, (0, NCp - num_classes)).reshape(1, NCp
                                                           ).astype(jnp.float32)

    # Pooling mask [1, Lout] (lane-dense): zero the 2*pad junk columns of each
    # flattened row band and fold in the 1/(H*W) mean scale.
    col = jnp.arange(Lout, dtype=jnp.int32) % Wp
    pool_mask = jnp.where(col < W, 1.0 / (H * W), 0.0).astype(
        jnp.float32).reshape(1, Lout)

    def kernel(x_ref, mask_ref, w_ref, bconv_ref, wcls_ref, bcls_ref, o_ref):
        # x_ref: [Bt, C_in, L] bf16 -- a block of padded, flattened images.
        pooled_rows = []
        for b in range(Bt):
            # Build the concatenated-tap operand once per image: a shift of
            # (ki, kj) in 2D == a lane offset of ki*Wp+kj in flattened space.
            taps = []
            for ki in range(KH):
                for kj in range(KW):
                    s = ki * Wp + kj
                    taps.append(x_ref[b, :, s:s + Lout])      # [C_in, Lout]
            xs = jnp.concatenate(taps, axis=0)                # [KK*C_in, Lout]
            # Conv as ONE fat-K matmul (bf16 in, f32 accumulate on the MXU).
            featT = jnp.dot(w_ref[...], xs,
                            preferred_element_type=jnp.float32)  # [Cp, Lout]
            featT = jnp.maximum(featT + bconv_ref[...], 0.0)      # bias + ReLU
            # Masked global-average-pool: contract the Lout (lane) axis of the
            # mask row against the Lout axis of featT -> one pooled row.
            pooled = jax.lax.dot_general(
                mask_ref[...], featT, (((1,), (1,)), ((), ())),
                preferred_element_type=jnp.float32)            # [1, Cp]
            pooled_rows.append(pooled)
        pooled_all = jnp.concatenate(pooled_rows, axis=0)       # [Bt, Cp]
        # One batched classifier matmul + one dense [Bt, NCp] store per step.
        logits = jnp.dot(pooled_all, wcls_ref[...],
                         preferred_element_type=jnp.float32) + bcls_ref[...]
        o_ref[...] = logits.astype(o_ref.dtype)

    out = pl.pallas_call(
        kernel,
        out_shape=jax.ShapeDtypeStruct((N_pad, NCp), jnp.float32),
        grid=(N_pad // Bt,),
        in_specs=[
            pl.BlockSpec((Bt, C_in, L), lambda g: (g, 0, 0)),   # per-block x
            pl.BlockSpec((1, Lout), lambda g: (0, 0)),          # VMEM-resident
            pl.BlockSpec((Cp, KK * C_in), lambda g: (0, 0)),
            pl.BlockSpec((Cp, 1), lambda g: (0, 0)),
            pl.BlockSpec((Cp, NCp), lambda g: (0, 0)),
            pl.BlockSpec((1, NCp), lambda g: (0, 0)),
        ],
        out_specs=pl.BlockSpec((Bt, NCp), lambda g: (g, 0)),
        compiler_params=pltpu.CompilerParams(
            dimension_semantics=("parallel",),                  # megacore
            vmem_limit_bytes=64 * 1024 * 1024),                 # v5e default=16MiB
    )(x_flat, pool_mask, w_all, b_conv, w_cls, b_cls)

    return out[:N, :num_classes]


predict = jax.jit(_predict_impl, static_argnames=("block_n",))


def _reference(x, conv_w, conv_b, cls_w, cls_b):
    """Pure-JAX reference (conv + bias + ReLU + GAP + linear), f32 HIGHEST."""
    y = jax.lax.conv_general_dilated(
        x, conv_w, window_strides=(1, 1), padding="SAME",
        dimension_numbers=("NCHW", "OIHW", "NCHW"),
        precision=jax.lax.Precision.HIGHEST)
    y = jnp.maximum(y + conv_b[None, :, None, None], 0.0)
    pooled = jnp.mean(y, axis=(2, 3))
    return jnp.dot(pooled, cls_w.T, precision=jax.lax.Precision.HIGHEST) + cls_b


if __name__ == "__main__":
    N, C_in, H, W = 2, 4, 16, 16
    C_out, num_classes = 32, 8

    key = jax.random.PRNGKey(0)
    k1, k2, k3, k4, k5 = jax.random.split(key, 5)
    x = jax.random.normal(k1, (N, C_in, H, W), jnp.float32)
    conv_w = jax.random.normal(k2, (C_out, C_in, 3, 3), jnp.float32) * 0.1
    conv_b = jax.random.normal(k3, (C_out,), jnp.float32) * 0.1
    cls_w = jax.random.normal(k4, (num_classes, C_out), jnp.float32) * 0.1
    cls_b = jax.random.normal(k5, (num_classes,), jnp.float32) * 0.1

    logits = predict(x, conv_w, conv_b, cls_w, cls_b)
    jax.block_until_ready(logits)
    assert logits.shape == (N, num_classes)
    assert logits.dtype == jnp.float32

    ref = _reference(x, conv_w, conv_b, cls_w, cls_b)
    max_err = float(jnp.max(jnp.abs(logits - ref)))
    # bf16 conv inputs (per perf feedback) vs. the f32 HIGHEST reference:
    # expected max |err| ~1e-3; 1e-2 keeps a comfortable margin.
    assert jnp.allclose(logits, ref, rtol=1e-2, atol=1e-2), max_err
    print("KERNEL_OK")
</pallas_src>

<mosaic_0001>
module attributes {stable_mosaic.version = 11 : i64} {
  func.func @kernel(%arg0: i32, %arg1: memref<2x4x324xbf16, #tpu.memory_space<vmem>>, %arg2: memref<1x286xf32, #tpu.memory_space<vmem>>, %arg3: memref<128x36xbf16, #tpu.memory_space<vmem>>, %arg4: memref<128x1xf32, #tpu.memory_space<vmem>>, %arg5: memref<128x128xf32, #tpu.memory_space<vmem>>, %arg6: memref<1x128xf32, #tpu.memory_space<vmem>>, %arg7: memref<2x128xf32, #tpu.memory_space<vmem>>) attributes {dimension_semantics = [#tpu.dimension_semantics<parallel>], iteration_bounds = array<i64: 1>, scalar_prefetch = 0 : i64, scratch_operands = 0 : i64, tpu.core_type = #tpu.core_type<tc>, window_params = [{transform_indices = @transform_0, window_bounds = array<i64: 2, 4, 324>}, {pipeline_mode = #tpu.pipeline_mode<synchronous>, transform_indices = @transform_1, window_bounds = array<i64: 1, 286>}, {pipeline_mode = #tpu.pipeline_mode<synchronous>, transform_indices = @transform_2, window_bounds = array<i64: 128, 36>}, {pipeline_mode = #tpu.pipeline_mode<synchronous>, transform_indices = @transform_3, window_bounds = array<i64: 128, 1>}, {pipeline_mode = #tpu.pipeline_mode<synchronous>, transform_indices = @transform_4, window_bounds = array<i64: 128, 128>}, {pipeline_mode = #tpu.pipeline_mode<synchronous>, transform_indices = @transform_5, window_bounds = array<i64: 1, 128>}, {transform_indices = @transform_6, window_bounds = array<i64: 2, 128>}]} {
    %c0 = arith.constant 0 : index
    %c0_0 = arith.constant 0 : index
    %c0_1 = arith.constant 0 : index
    %0 = vector.load %arg1[%c0, %c0_0, %c0_1] : memref<2x4x324xbf16, #tpu.memory_space<vmem>>, vector<1x4x286xbf16>
    %1 = vector.shape_cast %0 : vector<1x4x286xbf16> to vector<4x286xbf16>
    %c0_2 = arith.constant 0 : index
    %c0_3 = arith.constant 0 : index
    %c1 = arith.constant 1 : index
    %2 = vector.load %arg1[%c0_2, %c0_3, %c1] : memref<2x4x324xbf16, #tpu.memory_space<vmem>>, vector<1x4x286xbf16>
    %3 = vector.shape_cast %2 : vector<1x4x286xbf16> to vector<4x286xbf16>
    %c0_4 = arith.constant 0 : index
    %c0_5 = arith.constant 0 : index
    %c2 = arith.constant 2 : index
    %4 = vector.load %arg1[%c0_4, %c0_5, %c2] : memref<2x4x324xbf16, #tpu.memory_space<vmem>>, vector<1x4x286xbf16>
    %5 = vector.shape_cast %4 : vector<1x4x286xbf16> to vector<4x286xbf16>
    %c0_6 = arith.constant 0 : index
    %c0_7 = arith.constant 0 : index
    %c18 = arith.constant 18 : index
    %6 = vector.load %arg1[%c0_6, %c0_7, %c18] : memref<2x4x324xbf16, #tpu.memory_space<vmem>>, vector<1x4x286xbf16>
    %7 = vector.shape_cast %6 : vector<1x4x286xbf16> to vector<4x286xbf16>
    %c0_8 = arith.constant 0 : index
    %c0_9 = arith.constant 0 : index
    %c19 = arith.constant 19 : index
    %8 = vector.load %arg1[%c0_8, %c0_9, %c19] : memref<2x4x324xbf16, #tpu.memory_space<vmem>>, vector<1x4x286xbf16>
    %9 = vector.shape_cast %8 : vector<1x4x286xbf16> to vector<4x286xbf16>
    %c0_10 = arith.constant 0 : index
    %c0_11 = arith.constant 0 : index
    %c20 = arith.constant 20 : index
    %10 = vector.load %arg1[%c0_10, %c0_11, %c20] : memref<2x4x324xbf16, #tpu.memory_space<vmem>>, vector<1x4x286xbf16>
    %11 = vector.shape_cast %10 : vector<1x4x286xbf16> to vector<4x286xbf16>
    %c0_12 = arith.constant 0 : index
    %c0_13 = arith.constant 0 : index
    %c36 = arith.constant 36 : index
    %12 = vector.load %arg1[%c0_12, %c0_13, %c36] : memref<2x4x324xbf16, #tpu.memory_space<vmem>>, vector<1x4x286xbf16>
    %13 = vector.shape_cast %12 : vector<1x4x286xbf16> to vector<4x286xbf16>
    %c0_14 = arith.constant 0 : index
    %c0_15 = arith.constant 0 : index
    %c37 = arith.constant 37 : index
    %14 = vector.load %arg1[%c0_14, %c0_15, %c37] : memref<2x4x324xbf16, #tpu.memory_space<vmem>>, vector<1x4x286xbf16>
    %15 = vector.shape_cast %14 : vector<1x4x286xbf16> to vector<4x286xbf16>
    %c0_16 = arith.constant 0 : index
    %c0_17 = arith.constant 0 : index
    %c38 = arith.constant 38 : index
    %16 = vector.load %arg1[%c0_16, %c0_17, %c38] : memref<2x4x324xbf16, #tpu.memory_space<vmem>>, vector<1x4x286xbf16>
    %17 = vector.shape_cast %16 : vector<1x4x286xbf16> to vector<4x286xbf16>
    %18 = tpu.concatenate %1, %3, %5, %7, %9, %11, %13, %15, %17 in 0 : vector<4x286xbf16>, vector<4x286xbf16>, vector<4x286xbf16>, vector<4x286xbf16>, vector<4x286xbf16>, vector<4x286xbf16>, vector<4x286xbf16>, vector<4x286xbf16>, vector<4x286xbf16> -> vector<36x286xbf16>
    %c0_18 = arith.constant 0 : index
    %c0_19 = arith.constant 0 : index
    %19 = vector.load %arg3[%c0_18, %c0_19] : memref<128x36xbf16, #tpu.memory_space<vmem>>, vector<128x36xbf16>
    %cst = arith.constant dense<0.000000e+00> : vector<128x286xf32>
    %20 = tpu.matmul %19, %18, %cst {dimension_numbers = #tpu.dot_dimension_numbers<[1], [0], [0], [1], [0, 0, 1, 1], [], []>} : vector<128x36xbf16>, vector<36x286xbf16>, vector<128x286xf32> -> vector<128x286xf32>
    %c0_20 = arith.constant 0 : index
    %c0_21 = arith.constant 0 : index
    %21 = vector.load %arg4[%c0_20, %c0_21] : memref<128x1xf32, #tpu.memory_space<vmem>>, vector<128x1xf32>
    %22 = vector.broadcast %21 : vector<128x1xf32> to vector<128x286xf32>
    %23 = arith.addf %20, %22 : vector<128x286xf32>
    %cst_22 = arith.constant 0.000000e+00 : f32
    %24 = vector.broadcast %cst_22 : f32 to vector<128x286xf32>
    %25 = arith.maximumf %23, %24 : vector<128x286xf32>
    %c0_23 = arith.constant 0 : index
    %c0_24 = arith.constant 0 : index
    %26 = vector.load %arg2[%c0_23, %c0_24] : memref<1x286xf32, #tpu.memory_space<vmem>>, vector<1x286xf32>
    %cst_25 = arith.constant dense<0.000000e+00> : vector<1x128xf32>
    %27 = tpu.matmul %26, %25, %cst_25 {dimension_numbers = #tpu.dot_dimension_numbers<[1], [1], [0], [0], [0, 0, 1, 0], [], []>} : vector<1x286xf32>, vector<128x286xf32>, vector<1x128xf32> -> vector<1x128xf32>
    %c1_26 = arith.constant 1 : index
    %c0_27 = arith.constant 0 : index
    %c0_28 = arith.constant 0 : index
    %28 = vector.load %arg1[%c1_26, %c0_27, %c0_28] : memref<2x4x324xbf16, #tpu.memory_space<vmem>>, vector<1x4x286xbf16>
    %29 = vector.shape_cast %28 : vector<1x4x286xbf16> to vector<4x286xbf16>
    %c1_29 = arith.constant 1 : index
    %c0_30 = arith.constant 0 : index
    %c1_31 = arith.constant 1 : index
    %30 = vector.load %arg1[%c1_29, %c0_30, %c1_31] : memref<2x4x324xbf16, #tpu.memory_space<vmem>>, vector<1x4x286xbf16>
    %31 = vector.shape_cast %30 : vector<1x4x286xbf16> to vector<4x286xbf16>
    %c1_32 = arith.constant 1 : index
    %c0_33 = arith.constant 0 : index
    %c2_34 = arith.constant 2 : index
    %32 = vector.load %arg1[%c1_32, %c0_33, %c2_34] : memref<2x4x324xbf16, #tpu.memory_space<vmem>>, vector<1x4x286xbf16>
    %33 = vector.shape_cast %32 : vector<1x4x286xbf16> to vector<4x286xbf16>
    %c1_35 = arith.constant 1 : index
    %c0_36 = arith.constant 0 : index
    %c18_37 = arith.constant 18 : index
    %34 = vector.load %arg1[%c1_35, %c0_36, %c18_37] : memref<2x4x324xbf16, #tpu.memory_space<vmem>>, vector<1x4x286xbf16>
    %35 = vector.shape_cast %34 : vector<1x4x286xbf16> to vector<4x286xbf16>
    %c1_38 = arith.constant 1 : index
    %c0_39 = arith.constant 0 : index
    %c19_40 = arith.constant 19 : index
    %36 = vector.load %arg1[%c1_38, %c0_39, %c19_40] : memref<2x4x324xbf16, #tpu.memory_space<vmem>>, vector<1x4x286xbf16>
    %37 = vector.shape_cast %36 : vector<1x4x286xbf16> to vector<4x286xbf16>
    %c1_41 = arith.constant 1 : index
    %c0_42 = arith.constant 0 : index
    %c20_43 = arith.constant 20 : index
    %38 = vector.load %arg1[%c1_41, %c0_42, %c20_43] : memref<2x4x324xbf16, #tpu.memory_space<vmem>>, vector<1x4x286xbf16>
    %39 = vector.shape_cast %38 : vector<1x4x286xbf16> to vector<4x286xbf16>
    %c1_44 = arith.constant 1 : index
    %c0_45 = arith.constant 0 : index
    %c36_46 = arith.constant 36 : index
    %40 = vector.load %arg1[%c1_44, %c0_45, %c36_46] : memref<2x4x324xbf16, #tpu.memory_space<vmem>>, vector<1x4x286xbf16>
    %41 = vector.shape_cast %40 : vector<1x4x286xbf16> to vector<4x286xbf16>
    %c1_47 = arith.constant 1 : index
    %c0_48 = arith.constant 0 : index
    %c37_49 = arith.constant 37 : index
    %42 = vector.load %arg1[%c1_47, %c0_48, %c37_49] : memref<2x4x324xbf16, #tpu.memory_space<vmem>>, vector<1x4x286xbf16>
    %43 = vector.shape_cast %42 : vector<1x4x286xbf16> to vector<4x286xbf16>
    %c1_50 = arith.constant 1 : index
    %c0_51 = arith.constant 0 : index
    %c38_52 = arith.constant 38 : index
    %44 = vector.load %arg1[%c1_50, %c0_51, %c38_52] : memref<2x4x324xbf16, #tpu.memory_space<vmem>>, vector<1x4x286xbf16>
    %45 = vector.shape_cast %44 : vector<1x4x286xbf16> to vector<4x286xbf16>
    %46 = tpu.concatenate %29, %31, %33, %35, %37, %39, %41, %43, %45 in 0 : vector<4x286xbf16>, vector<4x286xbf16>, vector<4x286xbf16>, vector<4x286xbf16>, vector<4x286xbf16>, vector<4x286xbf16>, vector<4x286xbf16>, vector<4x286xbf16>, vector<4x286xbf16> -> vector<36x286xbf16>
    %c0_53 = arith.constant 0 : index
    %c0_54 = arith.constant 0 : index
    %47 = vector.load %arg3[%c0_53, %c0_54] : memref<128x36xbf16, #tpu.memory_space<vmem>>, vector<128x36xbf16>
    %cst_55 = arith.constant dense<0.000000e+00> : vector<128x286xf32>
    %48 = tpu.matmul %47, %46, %cst_55 {dimension_numbers = #tpu.dot_dimension_numbers<[1], [0], [0], [1], [0, 0, 1, 1], [], []>} : vector<128x36xbf16>, vector<36x286xbf16>, vector<128x286xf32> -> vector<128x286xf32>
    %c0_56 = arith.constant 0 : index
    %c0_57 = arith.constant 0 : index
    %49 = vector.load %arg4[%c0_56, %c0_57] : memref<128x1xf32, #tpu.memory_space<vmem>>, vector<128x1xf32>
    %50 = vector.broadcast %49 : vector<128x1xf32> to vector<128x286xf32>
    %51 = arith.addf %48, %50 : vector<128x286xf32>
    %cst_58 = arith.constant 0.000000e+00 : f32
    %52 = vector.broadcast %cst_58 : f32 to vector<128x286xf32>
    %53 = arith.maximumf %51, %52 : vector<128x286xf32>
    %c0_59 = arith.constant 0 : index
    %c0_60 = arith.constant 0 : index
    %54 = vector.load %arg2[%c0_59, %c0_60] : memref<1x286xf32, #tpu.memory_space<vmem>>, vector<1x286xf32>
    %cst_61 = arith.constant dense<0.000000e+00> : vector<1x128xf32>
    %55 = tpu.matmul %54, %53, %cst_61 {dimension_numbers = #tpu.dot_dimension_numbers<[1], [1], [0], [0], [0, 0, 1, 0], [], []>} : vector<1x286xf32>, vector<128x286xf32>, vector<1x128xf32> -> vector<1x128xf32>
    %56 = tpu.concatenate %27, %55 in 0 : vector<1x128xf32>, vector<1x128xf32> -> vector<2x128xf32>
    %c0_62 = arith.constant 0 : index
    %c0_63 = arith.constant 0 : index
    %57 = vector.load %arg5[%c0_62, %c0_63] : memref<128x128xf32, #tpu.memory_space<vmem>>, vector<128x128xf32>
    %cst_64 = arith.constant dense<0.000000e+00> : vector<2x128xf32>
    %58 = tpu.matmul %56, %57, %cst_64 {dimension_numbers = #tpu.dot_dimension_numbers<[1], [0], [0], [1], [0, 0, 1, 1], [], []>} : vector<2x128xf32>, vector<128x128xf32>, vector<2x128xf32> -> vector<2x128xf32>
    %c0_65 = arith.constant 0 : index
    %c0_66 = arith.constant 0 : index
    %59 = vector.load %arg6[%c0_65, %c0_66] : memref<1x128xf32, #tpu.memory_space<vmem>>, vector<1x128xf32>
    %60 = vector.broadcast %59 : vector<1x128xf32> to vector<2x128xf32>
    %61 = arith.addf %58, %60 : vector<2x128xf32>
    %c0_67 = arith.constant 0 : index
    %c0_68 = arith.constant 0 : index
    %62 = vector.load %arg7[%c0_67, %c0_68] : memref<2x128xf32, #tpu.memory_space<vmem>>, vector<2x128xf32>
    tpu.vector_store %arg7[%c0_67, %c0_68], %61 {strides = array<i32>} : memref<2x128xf32, #tpu.memory_space<vmem>>, vector<2x128xf32>,
    return
  }
  func.func @transform_0(%arg0: i32) -> (i32, i32, i32) {
    %c0_i32 = arith.constant 0 : i32
    %c0_i32_0 = arith.constant 0 : i32
    %c0_i32_1 = arith.constant 0 : i32
    return %arg0, %c0_i32, %c0_i32_0 : i32, i32, i32
  }
  func.func @transform_1(%arg0: i32) -> (i32, i32) {
    %c0_i32 = arith.constant 0 : i32
    %c0_i32_0 = arith.constant 0 : i32
    %c0_i32_1 = arith.constant 0 : i32
    return %c0_i32, %c0_i32_0 : i32, i32
  }
  func.func @transform_2(%arg0: i32) -> (i32, i32) {
    %c0_i32 = arith.constant 0 : i32
    %c0_i32_0 = arith.constant 0 : i32
    %c0_i32_1 = arith.constant 0 : i32
    return %c0_i32, %c0_i32_0 : i32, i32
  }
  func.func @transform_3(%arg0: i32) -> (i32, i32) {
    %c0_i32 = arith.constant 0 : i32
    %c0_i32_0 = arith.constant 0 : i32
    %c0_i32_1 = arith.constant 0 : i32
    return %c0_i32, %c0_i32_0 : i32, i32
  }
  func.func @transform_4(%arg0: i32) -> (i32, i32) {
    %c0_i32 = arith.constant 0 : i32
    %c0_i32_0 = arith.constant 0 : i32
    %c0_i32_1 = arith.constant 0 : i32
    return %c0_i32, %c0_i32_0 : i32, i32
  }
  func.func @transform_5(%arg0: i32) -> (i32, i32) {
    %c0_i32 = arith.constant 0 : i32
    %c0_i32_0 = arith.constant 0 : i32
    %c0_i32_1 = arith.constant 0 : i32
    return %c0_i32, %c0_i32_0 : i32, i32
  }
  func.func @transform_6(%arg0: i32) -> (i32, i32) {
    %c0_i32 = arith.constant 0 : i32
    %c0_i32_0 = arith.constant 0 : i32
    return %arg0, %c0_i32 : i32, i32
  }
}

</mosaic_0001>

<bundles_post_ra>
// kernel: _predict_impl.1
= control target key start
LH: loop header
LB: loop body
LE: loop exit
PB: predicated region body
PF: predicated region fallthrough
CT: control target
= control target key end

     0   :  { %s2310_s0 = inlined_call_operand.vmem [shape: bf16[2,4,324], index: 0, kind: input, shape index: {}]   ;;  %s2311_s1 = inlined_call_operand.vmem [shape: f32[1,286], index: 1, kind: input, shape index: {}]   ;;  %s2312_s2 = inlined_call_operand.vmem [shape: bf16[128,36], index: 2, kind: input, shape index: {}]   ;;  %s2313_s3 = inlined_call_operand.vmem [shape: f32[128,1], index: 3, kind: input, shape index: {}]   ;;  %s2314_s4 = inlined_call_operand.vmem [shape: f32[128,128], index: 4, kind: input, shape index: {}]   ;;  %s2315_s5 = inlined_call_operand.vmem [shape: f32[1,128], index: 5, kind: input, shape index: {}]   ;;  %s2316_s6 = inlined_call_operand.hbm [shape: f32[2,128], index: 6, kind: output, shape index: {}]  }
   0x1   :  { %v25_v0 = vld [vmem:[%s2310_s0] sm:$0x3f] }
   0x2   :  { %27 = vst [vmem:[#allocation1] ss:$4 sm:$0xff] %v25_v0 }
   0x3   :  { %11 = vsyncpa [#allocation3], 0  ;;  %s1427_s23 = smov 127   ;;  %s1428_s24 = smov 126   ;;  %v1502_v25 = vld [vmem:[%s2310_s0 + $0x6] sm:$0x3f] }
   0x4   :  { %s1429_s25 = smov 110   ;;  %s1430_s26 = smov 109   ;;  %v243_v32 = vld [vmem:[%s2313_s3 + $0x70] sm:$0xff]  ;;  %v1435_v33 = vmov 0   ;;  %v241_v37 = vld [vmem:[%s2313_s3 + $0x60] sm:$0xff]  ;;  %v244_v41 = vld [vmem:[%s2313_s3 + $0x78] sm:$0xff] }
   0x5   :  { %s1431_s27 = smov 108   ;;  %s1432_s28 = smov 92   ;;  %1398 = vset.pattern.permute.xlu1 %v1435_v33  ;;  %1397 = vset.pattern.permute.xlu0 %v1435_v33  ;;  %v238_v42 = vld [vmem:[%s2313_s3 + $0x48] sm:$0xff]  ;;  %v239_v46 = vld [vmem:[%s2313_s3 + $0x50] sm:$0xff]  ;;  %v236_v52 = vld [vmem:[%s2313_s3 + $0x38] sm:$0xff]  ;;  %vm165_vm0 = vcmask 1041408  }
   0x6   :  { %s1433_s29 = smov 91   ;;  %s1434_s8 = smov 90   ;;  %1399 = vset.pattern.permute.xlu2 %v1435_v33  ;;  %v235_v47 = vld [vmem:[%s2313_s3 + $0x30] sm:$0xff]  ;;  %v242_v48 = vld [vmem:[%s2313_s3 + $0x68] sm:$0xff]  ;;  %v232_v53 = vld [vmem:[%s2313_s3 + $0x18] sm:$0xff]  ;;  %vm112_vm1 = vcmask 883712  }
   0x7   :  { %v240_v54 = vld [vmem:[%s2313_s3 + $0x58] sm:$0xff]  ;;  %v233_v55 = vld [vmem:[%s2313_s3 + $0x20] sm:$0xff]  ;;  %v230_v60 = vld [vmem:[%s2313_s3 + $0x8] sm:$0xff]  ;;  %vm95_vm2 = vcmask 891904   ;;  %vm45_vm3 = vcmask 1039360   ;;  %vm162_vm4 = vcmask 736256  }
   0x8   :  { %v229_v56 = vld [vmem:[%s2313_s3] sm:$0xff]  ;;  %v234_v62 = vld [vmem:[%s2313_s3 + $0x28] sm:$0xff]  ;;  %vm129_vm5 = vcmask 752640   ;;  %vm146_vm6 = vcmask 744448   ;;  %vm62_vm7 = vcmask 1031168   ;;  %vm79_vm8 = vcmask 900096  }
   0x9   :  { %v1475_v1 = vld.sshfl [vmem:[#allocation1] sm:$0xff pattern:$0x73625140]  ;;  %v1477_v2 = vld.sshfl [vmem:[#allocation1 + $0x8] sm:$0xff pattern:$0x73625140] }
   0xa   :  { %v1479_v3 = vld.sshfl [vmem:[#allocation1 + $0x10] sm:$0xff pattern:$0x73625140]  ;;  %v237_v58 = vld [vmem:[%s2313_s3 + $0x40] sm:$0xff]  ;;  %vm172_vm9 = vcmask 1043456   ;;  %vm179_vm10 = vcmask 1045504  }
   0xb   :  { %32 = vst [vmem:[#allocation1 + $0x1] ss:$4 sm:$0xff] %v25_v0  ;;  %vm365_vm11 = vcmask 293888   ;;  %vm601_vm12 = vcmask 244736   ;;  %vm1205_vm13 = vcmask 1040384   ;;  %s1436_s19 = smov [#allocation2]  }
   0xc   :  { %s1253_s20 = sshll.u32 %s1436_s19, 4  ;;  %s1255_s22 = sshll.u32 %s2316_s6, 4  ;;  %s1254_s20 = int_to_ptr.vmem [resolvable:$true] %s1253_s20  ;;  %s1256_s22 = int_to_ptr.hbm [resolvable:$true] %s1255_s22 }
  0x12   :  { %v35_v4 = vld.sshfl [vmem:[#allocation1 + $0x8] sm:$0xff pattern:$0x73625140]  ;;  %v1481_v5 = vld.sshfl [vmem:[#allocation1 + $0x10] sm:$0xff pattern:$0x73625140] }
  0x13   :  { %41 = vrot.lane.b32.xlu2 %v35_v4, %s1427_s23  ;;  %v33_v6 = vld.sshfl [vmem:[#allocation1] sm:$0xff pattern:$0x73625140] }
  0x14   :  { %39 = vrot.lane.b32.xlu1 %v33_v6, %s1427_s23  ;;  %49 = vst [vmem:[#allocation1 + $0x2] ss:$4 sm:$0xff] %v25_v0  ;;  %v231_v6 = vld [vmem:[%s2313_s3 + $0x10] sm:$0xff] }
  0x1b   :  { %v52_v7 = vld.sshfl [vmem:[#allocation1 + $0x8] sm:$0xff pattern:$0x73625140]  ;;  %v54_v8 = vld.sshfl [vmem:[#allocation1 + $0x10] sm:$0xff pattern:$0x73625140] }
  0x1c   :  { %58 = vrot.lane.b32.xlu1 %v52_v7, %s1428_s24  ;;  %v50_v9 = vld.sshfl [vmem:[#allocation1] sm:$0xff pattern:$0x73625140] }
  0x1d   :  { %66 = vst [vmem:[#allocation1 + $0x3] ss:$4 sm:$0xff] %v25_v0  ;;  %56 = vrot.lane.b32.xlu0 %v50_v9, %s1428_s24 }
  0x24   :  { %v67_v10 = vld.sshfl [vmem:[#allocation1] sm:$0xff pattern:$0x73625140]  ;;  %v69_v11 = vld.sshfl [vmem:[#allocation1 + $0x8] sm:$0xff pattern:$0x73625140] }
  0x25   :  { %v71_v12 = vld.sshfl [vmem:[#allocation1 + $0x10] sm:$0xff pattern:$0x73625140]  ;;  %73 = vrot.lane.b32.xlu2 %v67_v10, %s1429_s25  ;;  %75 = vrot.lane.b32.xlu0 %v69_v11, %s1429_s25 }
  0x26   :  { %82 = vst [vmem:[#allocation1] ss:$4 sm:$0xff] %v25_v0 }
  0x2d   :  { %v87_v13 = vld.sshfl [vmem:[#allocation1 + $0x10] sm:$0xff pattern:$0x73625140]  ;;  %v83_v14 = vld.sshfl [vmem:[#allocation1] sm:$0xff pattern:$0x73625140] }
  0x2e   :  { %93 = vrot.lane.b32.xlu2 %v87_v13, %s1430_s26  ;;  %89 = vrot.lane.b32.xlu1 %v83_v14, %s1430_s26  ;;  %v85_v15 = vld.sshfl [vmem:[#allocation1 + $0x8] sm:$0xff pattern:$0x73625140] }
  0x2f   :  { %99 = vst [vmem:[#allocation1 + $0x1] ss:$4 sm:$0xff] %v25_v0 }
  0x36   :  { %91 = vrot.lane.b32.xlu1 %v85_v15, %s1430_s26  ;;  %v100_v16 = vld.sshfl [vmem:[#allocation1] sm:$0xff pattern:$0x73625140]  ;;  %v104_v17 = vld.sshfl [vmem:[#allocation1 + $0x10] sm:$0xff pattern:$0x73625140] }
  0x37   :  { %106 = vrot.lane.b32.xlu2 %v100_v16, %s1431_s27  ;;  %v102_v18 = vld.sshfl [vmem:[#allocation1 + $0x8] sm:$0xff pattern:$0x73625140] }
  0x38   :  { %116 = vst [vmem:[#allocation1 + $0x2] ss:$4 sm:$0xff] %v25_v0 }
  0x3f   :  { %108 = vrot.lane.b32.xlu2 %v102_v18, %s1431_s27  ;;  %v119_v19 = vld.sshfl [vmem:[#allocation1 + $0x8] sm:$0xff pattern:$0x73625140]  ;;  %v117_v20 = vld.sshfl [vmem:[#allocation1] sm:$0xff pattern:$0x73625140] }
  0x40   :  { %125 = vrot.lane.b32.xlu1 %v119_v19, %s1432_s28  ;;  %123 = vrot.lane.b32.xlu0 %v117_v20, %s1432_s28  ;;  %v121_v21 = vld.sshfl [vmem:[#allocation1 + $0x10] sm:$0xff pattern:$0x73625140] }
  0x41   :  { %133 = vst [vmem:[#allocation1 + $0x3] ss:$4 sm:$0xff] %v25_v0 }
  0x48   :  { %127 = vrot.lane.b32.xlu1 %v121_v21, %s1432_s28  ;;  %v136_v22 = vld.sshfl [vmem:[#allocation1 + $0x8] sm:$0xff pattern:$0x73625140]  ;;  %v134_v23 = vld.sshfl [vmem:[#allocation1] sm:$0xff pattern:$0x73625140] }
  0x49   :  { %142 = vrot.lane.b32.xlu0 %v136_v22, %s1433_s29  ;;  %140 = vrot.lane.b32.xlu2 %v134_v23, %s1433_s29  ;;  %v138_v24 = vld.sshfl [vmem:[#allocation1 + $0x10] sm:$0xff pattern:$0x73625140] }
  0x4a   :  { %149 = vst [vmem:[#allocation1] ss:$4 sm:$0xff] %v25_v0 }
  0x51   :  { %144 = vrot.lane.b32.xlu2 %v138_v24, %s1433_s29  ;;  %v154_v26 = vld.sshfl [vmem:[#allocation1 + $0x10] sm:$0xff pattern:$0x73625140]  ;;  %v150_v27 = vld.sshfl [vmem:[#allocation1] sm:$0xff pattern:$0x73625140] }
  0x52   :  { %160 = vrot.lane.b32.xlu1 %v154_v26, %s1434_s8  ;;  %156 = vrot.lane.b32.xlu0 %v150_v27, %s1434_s8  ;;  %v152_v28 = vld.sshfl [vmem:[#allocation1 + $0x8] sm:$0xff pattern:$0x73625140] }
  0x53   :  { %715 = vst [vmem:[#allocation1] ss:$4 sm:$0xff] %v1502_v25 }
  0x59   :  { %77 = vrot.lane.b32.xlu2 %v71_v12, %s1429_s25 }
  0x5a   :  { %60 = vrot.lane.b32.xlu1 %v54_v8, %s1428_s24  ;;  %158 = vrot.lane.b32.xlu0 %v152_v28, %s1434_s8  ;;  %v1511_v29 = vld.sshfl [vmem:[#allocation1] sm:$0xff pattern:$0x73625140]  ;;  %v1513_v30 = vld.sshfl [vmem:[#allocation1 + $0x8] sm:$0xff pattern:$0x73625140] }
  0x5b   :  { %v1515_v31 = vld.sshfl [vmem:[#allocation1 + $0x10] sm:$0xff pattern:$0x73625140] }
  0x5c   :  { %720 = vst [vmem:[#allocation1 + $0x1] ss:$4 sm:$0xff] %v1502_v25 }
  0x61   :  { %312 = vperm.xlu2 %1399, %v242_v48  }
  0x62   :  { %110 = vrot.lane.b32.xlu0 %v104_v17, %s1431_s27  ;;  %317 = vperm.xlu1 %1398, %v243_v32  }
  0x63   :  { %v1522_v34 = vld.sshfl [vmem:[#allocation1] sm:$0xff pattern:$0x73625140]  ;;  %v1524_v35 = vld.sshfl [vmem:[#allocation1 + $0x8] sm:$0xff pattern:$0x73625140] }
  0x64   :  { %v1526_v36 = vld.sshfl [vmem:[#allocation1 + $0x10] sm:$0xff pattern:$0x73625140] }
  0x65   :  { %736 = vst [vmem:[#allocation1 + $0x2] ss:$4 sm:$0xff] %v1502_v25 }
  0x69   :  { %302 = vperm.xlu2 %1399, %v240_v54  }
  0x6a   :  { %43 = vrot.lane.b32.xlu0 %v1481_v5, %s1427_s23  ;;  %307 = vperm.xlu1 %1398, %v241_v37  }
  0x6c   :  { %v1534_v38 = vld.sshfl [vmem:[#allocation1] sm:$0xff pattern:$0x73625140]  ;;  %v1536_v39 = vld.sshfl [vmem:[#allocation1 + $0x8] sm:$0xff pattern:$0x73625140] }
  0x6d   :  { %v1538_v40 = vld.sshfl [vmem:[#allocation1 + $0x10] sm:$0xff pattern:$0x73625140]  ;;  %v1579_v57 = vpop.permute.xlu2 %41 }
  0x6e   :  { %752 = vst [vmem:[#allocation1 + $0x3] ss:$4 sm:$0xff] %v1502_v25 }
  0x71   :  { %287 = vperm.xlu2 %1399, %v237_v58  }
  0x72   :  { %322 = vperm.xlu0 %1397, %v244_v41   ;;  %292 = vperm.xlu1 %1398, %v238_v42  }
  0x75   :  { %v1547_v43 = vld.sshfl [vmem:[#allocation1] sm:$0xff pattern:$0x73625140]  ;;  %v1549_v44 = vld.sshfl [vmem:[#allocation1 + $0x8] sm:$0xff pattern:$0x73625140] }
  0x76   :  { %v1551_v45 = vld.sshfl [vmem:[#allocation1 + $0x10] sm:$0xff pattern:$0x73625140] }
  0x77   :  { %767 = vst [vmem:[#allocation1] ss:$4 sm:$0xff] %v1502_v25 }
  0x79   :  { %272 = vperm.xlu2 %1399, %v234_v62  }
  0x7a   :  { %297 = vperm.xlu0 %1397, %v239_v46   ;;  %277 = vperm.xlu1 %1398, %v235_v47  }
  0x7e   :  { %v768_v49 = vld.sshfl [vmem:[#allocation1] sm:$0xff pattern:$0x73625140]  ;;  %v770_v50 = vld.sshfl [vmem:[#allocation1 + $0x8] sm:$0xff pattern:$0x73625140] }
  0x7f   :  { %v772_v51 = vld.sshfl [vmem:[#allocation1 + $0x10] sm:$0xff pattern:$0x73625140]  ;;  %v1593_v63 = vpop.permute.xlu2 %73 }
  0x80   :  { %783 = vst [vmem:[#allocation1 + $0x1] ss:$4 sm:$0xff] %v1502_v25 }
  0x81   :  { %257 = vperm.xlu2 %1399, %v231_v6  }
  0x82   :  { %282 = vperm.xlu0 %1397, %v236_v52   ;;  %262 = vperm.xlu1 %1398, %v232_v53  }
  0x86   :  { %v1584_v59 = vpop.permute.xlu1 %39 }
  0x87   :  { %v788_v61 = vld.sshfl [vmem:[#allocation1 + $0x10] sm:$0xff pattern:$0x73625140]  ;;  %v784_v0 = vld.sshfl [vmem:[#allocation1] sm:$0xff pattern:$0x73625140]  ;;  %v46_v41 = vsel %vm45_vm3, %v1584_v59, %v1579_v57 }
  0x88   :  { %v786_v4 = vld.sshfl [vmem:[#allocation1 + $0x8] sm:$0xff pattern:$0x73625140]  ;;  %v1603_v7 = vpop.permute.xlu2 %93 }
  0x89   :  { %799 = vst [vmem:[#allocation1 + $0x2] ss:$4 sm:$0xff] %v1502_v25  ;;  %776 = vrot.lane.b32.xlu2 %v770_v50, %s1430_s26 }
  0x8a   :  { %267 = vperm.xlu0 %1397, %v233_v55   ;;  %247 = vperm.xlu1 %1398, %v229_v56  }
  0x8e   :  { %v1595_v5 = vpop.permute.xlu1 %58 }
  0x8f   :  { %v1605_v10 = vpop.permute.xlu0 %56 }
  0x90   :  { %v800_v8 = vld.sshfl [vmem:[#allocation1] sm:$0xff pattern:$0x73625140]  ;;  %v802_v9 = vld.sshfl [vmem:[#allocation1 + $0x8] sm:$0xff pattern:$0x73625140]  ;;  %v63_v50 = vsel %vm62_vm7, %v1605_v10, %v1595_v5 }
  0x91   :  { %v804_v12 = vld.sshfl [vmem:[#allocation1 + $0x10] sm:$0xff pattern:$0x73625140]  ;;  %v107_v16 = vpop.permute.xlu2 %106  ;;  %778 = vrot.lane.b32.xlu2 %v772_v51, %s1430_s26 }
  0x92   :  { %252 = vperm.xlu0 %1397, %v230_v60   ;;  %774 = vrot.lane.b32.xlu1 %v768_v49, %s1430_s26  ;;  %815 = vst [vmem:[#allocation1 + $0x3] ss:$4 sm:$0xff] %v1502_v25  ;;  %v167_v49 = vsel %vm165_vm0, %v1475_v1, %v46_v41 }
  0x93   :  { %v174_v55 = vsel %vm172_vm9, %v167_v49, %v63_v50 }
  0x97   :  { %v1613_v17 = vpop.permute.xlu0 %75 }
  0x98   :  { %v80_v1 = vsel %vm79_vm8, %v1593_v63, %v1613_v17 }
  0x99   :  { %v818_v14 = vld.sshfl [vmem:[#allocation1 + $0x8] sm:$0xff pattern:$0x73625140]  ;;  %v820_v15 = vld.sshfl [vmem:[#allocation1 + $0x10] sm:$0xff pattern:$0x73625140]  ;;  %v109_v21 = vpop.permute.xlu2 %108  ;;  %729 = vrot.lane.b32.xlu2 %v1524_v35, %s1427_s23  ;;  %v181_v63 = vsel %vm179_vm10, %v174_v55, %v80_v1 }
  0x9a   :  { %790 = vrot.lane.b32.xlu0 %v784_v0, %s1431_s27  ;;  %792 = vrot.lane.b32.xlu1 %v786_v4, %s1431_s27  ;;  %v816_v18 = vld.sshfl [vmem:[#allocation1] sm:$0xff pattern:$0x73625140]  ;;  %v1794_v1 = vld [vmem:[%s2312_s2 + $0x28] sm:$0xff] }
  0x9b   :  { %830 = vst [vmem:[#allocation1] ss:$4 sm:$0xff] %v1502_v25  ;;  %v1683_v4 = vld [vmem:[%s2312_s2] sm:$0xff] }
  0x9c   :  { %2328 = vst [vmem:[#allocation5_spill] sm:$0xff] %v1683_v4 }
  0x9d   :  { %2334 = vst [vmem:[#allocation11_spill] sm:$0xff] %v1794_v1 }
  0xa0   :  { %v90_v11 = vpop.permute.xlu1 %89 }
  0xa1   :  { %824 = vrot.lane.b32.xlu2 %v818_v14, %s1433_s29 }
  0xa2   :  { %794 = vrot.lane.b32.xlu0 %v788_v61, %s1431_s27  ;;  %808 = vrot.lane.b32.xlu1 %v802_v9, %s1432_s28  ;;  %v833_v22 = vld.sshfl [vmem:[#allocation1 + $0x8] sm:$0xff pattern:$0x73625140]  ;;  %v831_v33 = vld.sshfl [vmem:[#allocation1] sm:$0xff pattern:$0x73625140] }
  0xa3   :  { %v141_v25 = vpop.permute.xlu2 %140  ;;  %v835_v54 = vld.sshfl [vmem:[#allocation1 + $0x10] sm:$0xff pattern:$0x73625140] }
  0xa8   :  { %v1611_v13 = vpop.permute.xlu1 %91 }
  0xa9   :  { %v96_v35 = vsel %vm95_vm2, %v90_v11, %v1611_v13  ;;  %837 = vrot.lane.b32.xlu2 %v831_v33, %s1434_s8  ;;  %v97_v59 = vsel %vm95_vm2, %v1611_v13, %v1603_v7 }
  0xaa   :  { %806 = vrot.lane.b32.xlu0 %v800_v8, %s1432_s28  ;;  %822 = vrot.lane.b32.xlu1 %v816_v18, %s1433_s29 }
  0xab   :  { %v145_v32 = vpop.permute.xlu2 %144 }
  0xb1   :  { %841 = vrot.lane.b32.xlu2 %v835_v54, %s1434_s8 }
  0xb2   :  { %v1619_v19 = vpop.permute.xlu1 %125  ;;  %v124_v20 = vpop.permute.xlu0 %123  ;;  %810 = vrot.lane.b32.xlu0 %v804_v12, %s1432_s28  ;;  %727 = vrot.lane.b32.xlu1 %v1522_v34, %s1427_s23  ;;  %v113_v34 = vsel %vm112_vm1, %v107_v16, %v109_v21 }
  0xb3   :  { %v130_v46 = vsel %vm129_vm5, %v124_v20, %v1619_v19  ;;  %v78_v52 = vpop.permute.xlu2 %77 }
  0xb9   :  { %745 = vrot.lane.b32.xlu2 %v1536_v39, %s1428_s24  ;;  %v81_v39 = vsel %vm79_vm8, %v1613_v17, %v78_v52  ;;  %v1726_v17 = vld [vmem:[%s2312_s2 + $0x8] sm:$0xff] }
  0xba   :  { %v128_v23 = vpop.permute.xlu1 %127  ;;  %839 = vrot.lane.b32.xlu0 %v833_v22, %s1434_s8  ;;  %743 = vrot.lane.b32.xlu1 %v1534_v38, %s1428_s24  ;;  %2329 = vst [vmem:[#allocation6_spill] sm:$0xff] %v1726_v17 }
  0xbb   :  { %v143_v24 = vpop.permute.xlu0 %142  ;;  %v131_v61 = vsel %vm129_vm5, %v1619_v19, %v128_v23  ;;  %v1691_v10 = vpop.permute.xlu2 %312 }
  0xbc   :  { %v147_v48 = vsel %vm146_vm6, %v141_v25, %v143_v24  ;;  %v148_v6 = vsel %vm146_vm6, %v143_v24, %v145_v32 }
  0xc1   :  { %761 = vrot.lane.b32.xlu2 %v1549_v44, %s1429_s25 }
  0xc2   :  { %826 = vrot.lane.b32.xlu0 %v820_v15, %s1433_s29  ;;  %759 = vrot.lane.b32.xlu1 %v1547_v43, %s1429_s25  ;;  %v191_v43 = vsel %vm165_vm0, %v96_v35, %v113_v34 }
  0xc3   :  { %v199_v51 = vsel %vm172_vm9, %v191_v43, %v130_v46 }
  0xc4   :  { %v161_v26 = vpop.permute.xlu1 %160  ;;  %v157_v27 = vpop.permute.xlu0 %156  ;;  %v205_v53 = vsel %vm179_vm10, %v199_v51, %v147_v48 }
  0xc5   :  { %v397_v28 = vsel %vm165_vm0, %v161_v26, 0 }
  0xc6   :  { %502 = vmatpush.bf16.msra.mxu2 %v397_v28 }
  0xca   :  { %731 = vrot.lane.b32.xlu0 %v1526_v36, %s1427_s23  ;;  %763 = vrot.lane.b32.xlu1 %v1551_v45, %s1429_s25 }
  0xcc   :  { %v61_v37 = vpop.permute.xlu1 %60  ;;  %v159_v38 = vpop.permute.xlu0 %158 }
  0xcd   :  { %v163_v36 = vsel %vm162_vm4, %v157_v27, %v159_v38  ;;  %v164_v42 = vsel %vm162_vm4, %v159_v38, %v161_v26  ;;  %v64_v15 = vsel %vm62_vm7, %v1595_v5, %v61_v37  ;;  %v1749_v26 = vld [vmem:[%s2312_s2 + $0x10] sm:$0xff] }
  0xce   :  { %v391_v45 = vsel %vm165_vm0, %v163_v36, 0  ;;  %v394_v47 = vsel %vm165_vm0, %v164_v42, 0  ;;  %2330 = vst [vmem:[#allocation7_spill] sm:$0xff] %v1749_v26 }
  0xcf   :  { %404 = vmatpush.bf16.msra.mxu0 %v391_v45  ;;  %453 = vmatpush.bf16.msra.mxu1 %v394_v47  ;;  %v1780_v47 = vld [vmem:[%s2312_s2 + $0x20] sm:$0xff] }
  0xd0   :  { %2332 = vst [vmem:[#allocation9_spill] sm:$0xff] %v1780_v47 }
  0xd2   :  { %747 = vrot.lane.b32.xlu0 %v1538_v40, %s1428_s24 }
  0xd3   :  { %405 = vmatpush.bf16.msra.mxu0 %v205_v53 }
  0xd4   :  { %v111_v56 = vpop.permute.xlu0 %110  ;;  %v1667_v58 = vpop.permute.xlu1 %317 }
  0xd5   :  { %v114_v60 = vsel %vm112_vm1, %v109_v21, %v111_v56  ;;  %v197_v40 = vsel %vm165_vm0, %v1603_v7, %v111_v56 }
  0xd6   :  { %v194_v62 = vsel %vm165_vm0, %v97_v59, %v114_v60  ;;  %v203_v0 = vsel %vm172_vm9, %v197_v40, %v128_v23 }
  0xd7   :  { %406 = vmatpush.bf16.msra.mxu0 %v181_v63  ;;  %v211_v8 = vsel %vm179_vm10, %v203_v0, %v145_v32  ;;  %v201_v7 = vsel %vm172_vm9, %v194_v62, %v131_v61 }
  0xd8   :  { %503 = vmatpush.bf16.msra.mxu2 %v211_v8  ;;  %v208_v9 = vsel %vm179_vm10, %v201_v7, %v148_v6  ;;  %v1815_v7 = vld [vmem:[%s2312_s2 + $0x30] sm:$0xff] }
  0xd9   :  { %454 = vmatpush.bf16.msra.mxu1 %v208_v9  ;;  %2337 = vst [vmem:[#allocation14_spill] sm:$0xff] %v1815_v7 }
  0xda   :  { %1296 = vmatmul.msk.bf16.vlgmr.msra.gmra.mxu0 %vm365_vm11, %v1683_v4 }
  0xdc   :  { %v44_v11 = vpop.permute.xlu0 %43  ;;  %v1695_v12 = vpop.permute.xlu1 %307 }
  0xdd   :  { %v47_v13 = vsel %vm45_vm3, %v1579_v57, %v44_v11  ;;  %v171_v14 = vsel %vm165_vm0, %v1479_v3, %v44_v11  ;;  %v1719_v3 = vpop.permute.xlu2 %302 }
  0xde   :  { %v169_v16 = vsel %vm165_vm0, %v1477_v2, %v47_v13  ;;  %v178_v18 = vsel %vm172_vm9, %v171_v14, %v61_v37  ;;  %v1768_v37 = vld [vmem:[%s2312_s2 + $0x18] sm:$0xff] }
  0xdf   :  { %v187_v19 = vsel %vm179_vm10, %v178_v18, %v78_v52  ;;  %v176_v20 = vsel %vm172_vm9, %v169_v16, %v64_v15  ;;  %2331 = vst [vmem:[#allocation8_spill] sm:$0xff] %v1768_v37 }
  0xe0   :  { %504 = vmatpush.bf16.msra.mxu2 %v187_v19  ;;  %v184_v57 = vsel %vm179_vm10, %v176_v20, %v81_v39 }
  0xe1   :  { %455 = vmatpush.bf16.msra.mxu1 %v184_v57 }
  0xe3   :  { %1312 = vmatmul.msk.bf16.vlgmr.msra.gmra.mxu2 %vm365_vm11, %v1683_v4 }
  0xe4   :  { %1304 = vmatmul.msk.bf16.vlgmr.msra.gmra.mxu1 %vm365_vm11, %v1683_v4  ;;  %v1717_v2 = vpop.permute.xlu0 %322  ;;  %v1721_v5 = vpop.permute.xlu1 %292 }
  0xe5   :  { %v1732_v44 = vpop.permute.xlu2 %287 }
  0xea   :  { %1297 = vmatmul.msk.bf16.gmra.mxu0 %vm365_vm11, %v1726_v17 }
  0xec   :  { %v1730_v21 = vpop.permute.xlu0 %297  ;;  %v1734_v22 = vpop.permute.xlu1 %277 }
  0xed   :  { %v1742_v24 = vpop.permute.xlu2 %272 }
  0xf3   :  { %1313 = vmatmul.msk.bf16.gmra.mxu2 %vm365_vm11, %v1726_v17 }
  0xf4   :  { %1305 = vmatmul.msk.bf16.gmra.mxu1 %vm365_vm11, %v1726_v17  ;;  %v1740_v23 = vpop.permute.xlu0 %282  ;;  %v1744_v25 = vpop.permute.xlu1 %262 }
  0xf5   :  { %v1755_v28 = vpop.permute.xlu2 %257 }
  0xfa   :  { %1298 = vmatmul.msk.bf16.gmra.mxu0 %vm365_vm11, %v1749_v26 }
  0xfc   :  { %v1753_v27 = vpop.permute.xlu0 %267  ;;  %v1757_v32 = vpop.permute.xlu1 %247 }
  0xfd   :  { %v777_v34 = vpop.permute.xlu2 %776 }
 0x103   :  { %1314 = vmatmul.msk.bf16.gmra.mxu2 %vm365_vm11, %v1749_v26 }
 0x104   :  { %1306 = vmatmul.msk.bf16.gmra.mxu1 %vm365_vm11, %v1749_v26  ;;  %v1763_v33 = vpop.permute.xlu0 %252  ;;  %v775_v35 = vpop.permute.xlu1 %774 }
 0x105   :  { %v779_v41 = vpop.permute.xlu2 %778  ;;  %v780_v60 = vsel %vm95_vm2, %v775_v35, %v777_v34 }
 0x106   :  { %v781_v40 = vsel %vm95_vm2, %v777_v34, %v779_v41 }
 0x10a   :  { %1299 = vmatmul.msk.bf16.gmra.mxu0 %vm365_vm11, %v1768_v37 }
 0x10c   :  { %v791_v38 = vpop.permute.xlu0 %790  ;;  %v793_v36 = vpop.permute.xlu1 %792 }
 0x10d   :  { %v730_v43 = vpop.permute.xlu2 %729  ;;  %v796_v61 = vsel %vm112_vm1, %v791_v38, %v793_v36 }
 0x10e   :  { %v868_v6 = vsel %vm165_vm0, %v780_v60, %v796_v61 }
 0x113   :  { %1315 = vmatmul.msk.bf16.gmra.mxu2 %vm365_vm11, %v1768_v37 }
 0x114   :  { %1307 = vmatmul.msk.bf16.gmra.mxu1 %vm365_vm11, %v1768_v37  ;;  %v795_v42 = vpop.permute.xlu0 %794  ;;  %v809_v45 = vpop.permute.xlu1 %808 }
 0x115   :  { %v874_v46 = vsel %vm165_vm0, %v779_v41, %v795_v42  ;;  %v825_v49 = vpop.permute.xlu2 %824  ;;  %v797_v62 = vsel %vm112_vm1, %v793_v36, %v795_v42 }
 0x116   :  { %v871_v8 = vsel %vm165_vm0, %v781_v40, %v797_v62 }
 0x11a   :  { %1300 = vmatmul.msk.bf16.gmra.mxu0 %vm365_vm11, %v1780_v47 }
 0x11c   :  { %v807_v48 = vpop.permute.xlu0 %806  ;;  %v823_v50 = vpop.permute.xlu1 %822 }
 0x11d   :  { %v838_v54 = vpop.permute.xlu2 %837  ;;  %v812_v11 = vsel %vm129_vm5, %v807_v48, %v809_v45  ;;  %v828_v18 = vsel %vm146_vm6, %v823_v50, %v825_v49 }
 0x11e   :  { %v876_v34 = vsel %vm172_vm9, %v868_v6, %v812_v11 }
 0x11f   :  { %v882_v38 = vsel %vm179_vm10, %v876_v34, %v828_v18 }
 0x123   :  { %1316 = vmatmul.msk.bf16.gmra.mxu2 %vm365_vm11, %v1780_v47 }
 0x124   :  { %1308 = vmatmul.msk.bf16.gmra.mxu1 %vm365_vm11, %v1780_v47  ;;  %v811_v51 = vpop.permute.xlu0 %810  ;;  %v728_v53 = vpop.permute.xlu1 %727 }
 0x125   :  { %v1789_v52 = vsel %vm172_vm9, %v874_v46, %v811_v51  ;;  %v1798_v59 = vpop.permute.xlu2 %841  ;;  %v813_v13 = vsel %vm129_vm5, %v809_v45, %v811_v51  ;;  %v733_v20 = vsel %vm45_vm3, %v728_v53, %v730_v43 }
 0x126   :  { %2333 = vst [vmem:[#allocation10_spill] sm:$0xff] %v1789_v52  ;;  %v878_v57 = vsel %vm172_vm9, %v871_v8, %v813_v13  ;;  %v846_v41 = vsel %vm165_vm0, %v1511_v29, %v733_v20 }
 0x127   :  { %2335 = vst [vmem:[#allocation12_spill] sm:$0xff] %v1798_v59 }
 0x12a   :  { %1301 = vmatmul.msk.bf16.gmra.mxu0 %vm365_vm11, %v1794_v1 }
 0x12c   :  { %v840_v55 = vpop.permute.xlu0 %839  ;;  %v744_v56 = vpop.permute.xlu1 %743 }
 0x12d   :  { %v746_v0 = vpop.permute.xlu2 %745  ;;  %v844_v9 = vsel %vm162_vm4, %v840_v55, %v1798_v59  ;;  %v843_v16 = vsel %vm162_vm4, %v838_v54, %v840_v55 }
 0x12e   :  { %v894_v15 = vsel %vm165_vm0, %v844_v9, 0  ;;  %v891_v19 = vsel %vm165_vm0, %v843_v16, 0  ;;  %v749_v42 = vsel %vm62_vm7, %v744_v56, %v746_v0 }
 0x12f   :  { %953 = vmatpush.bf16.msrb.mxu2 %v894_v15  ;;  %904 = vmatpush.bf16.msrb.mxu1 %v891_v19  ;;  %v852_v48 = vsel %vm172_vm9, %v846_v41, %v749_v42 }
 0x133   :  { %1317 = vmatmul.msk.bf16.gmra.mxu2 %vm365_vm11, %v1794_v1  ;;  %905 = vmatpush.bf16.msrb.mxu1 %v882_v38 }
 0x134   :  { %1309 = vmatmul.msk.bf16.gmra.mxu1 %vm365_vm11, %v1794_v1  ;;  %v1808_v63 = vpop.permute.xlu0 %826  ;;  %v760_v14 = vpop.permute.xlu1 %759 }
 0x135   :  { %2336 = vst [vmem:[#allocation13_spill] sm:$0xff] %v1808_v63  ;;  %v829_v39 = vsel %vm146_vm6, %v825_v49, %v1808_v63  ;;  %v762_v46 = vpop.permute.xlu2 %761 }
 0x136   :  { %v885_v35 = vsel %vm179_vm10, %v878_v57, %v829_v39  ;;  %v765_v45 = vsel %vm79_vm8, %v760_v14, %v762_v46 }
 0x137   :  { %954 = vmatpush.bf16.msrb.mxu2 %v885_v35  ;;  %v858_v50 = vsel %vm179_vm10, %v852_v48, %v765_v45 }
 0x138   :  { %906 = vmatpush.bf16.msrb.mxu1 %v858_v50 }
 0x13a   :  { %1302 = vmatmul.msk.bf16.gmra.mxu0 %vm365_vm11, %v1815_v7 }
 0x13c   :  { %v732_v36 = vpop.permute.xlu0 %731  ;;  %v1841_v51 = vpop.permute.xlu1 %763 }
 0x13d   :  { %v734_v49 = vsel %vm45_vm3, %v730_v43, %v732_v36  ;;  %2338 = vst [vmem:[#allocation15_spill] sm:$0xff] %v1841_v51  ;;  %v850_v29 = vsel %vm165_vm0, %v1515_v31, %v732_v36  ;;  %v766_v43 = vsel %vm79_vm8, %v762_v46, %v1841_v51  ;;  %v1860_v31 = vld [vmem:[%s2312_s2 + $0x38] sm:$0xff] }
 0x13e   :  { %v848_v53 = vsel %vm165_vm0, %v1513_v30, %v734_v49  ;;  %2340 = vst [vmem:[#allocation17_spill] sm:$0xff] %v1860_v31 }
 0x143   :  { %1318 = vmatmul.msk.bf16.gmra.mxu2 %vm365_vm11, %v1815_v7 }
 0x144   :  { %1310 = vmatmul.msk.bf16.gmra.mxu1 %vm365_vm11, %v1815_v7  ;;  %v748_v54 = vpop.permute.xlu0 %747 }
 0x145   :  { %v750_v55 = vsel %vm62_vm7, %v746_v0, %v748_v54  ;;  %v1855_v56 = vsel %vm172_vm9, %v850_v29, %v748_v54 }
 0x146   :  { %2339 = vst [vmem:[#allocation16_spill] sm:$0xff] %v1855_v56  ;;  %v854_v60 = vsel %vm172_vm9, %v848_v53, %v750_v55 }
 0x147   :  { %v861_v30 = vsel %vm179_vm10, %v854_v60, %v766_v43 }
 0x148   :  { %955 = vmatpush.bf16.msrb.mxu2 %v861_v30 }
 0x14a   :  { %1303 = vmatmul.msk.bf16.gmra.mxu0 %vm365_vm11, %v1860_v31 }
 0x153   :  { %1319 = vmatmul.msk.bf16.gmra.mxu2 %vm365_vm11, %v1860_v31 }
 0x154   :  { %1311 = vmatmul.msk.bf16.gmra.mxu1 %vm365_vm11, %v1860_v31 }
 0x157   :  { %v1870_v40 = vpop.f32.mrf.mxu0 }
 0x15f   :  { %v1872_v61 = vpop.f32.mrf.mxu0 }
 0x161   :  { %v1874_v62 = vpop.f32.mrf.mxu1 }
 0x162   :  { %2341 = vst [vmem:[#allocation18_spill] sm:$0xff] %v1874_v62 }
 0x163   :  { %1346 = vmatmul.msk.bf16.vlgmr.msrb.gmra.mxu2 %vm365_vm11, %v1683_v4 }
 0x164   :  { %1338 = vmatmul.msk.bf16.vlgmr.msrb.gmra.mxu1 %vm365_vm11, %v1683_v4 }
 0x166   :  { %v1880_v0 = vpop.f32.mrf.mxu2 }
 0x167   :  { %v1882_v6 = vpop.f32.mrf.mxu0 }
 0x169   :  { %v1884_v8 = vpop.f32.mrf.mxu1 }
 0x16a   :  { %2342 = vst [vmem:[#allocation19_spill] sm:$0xff] %v1884_v8 }
 0x16e   :  { %v1886_v9 = vpop.f32.mrf.mxu2 }
 0x16f   :  { %v1888_v11 = vpop.f32.mrf.mxu0 }
 0x171   :  { %v1890_v13 = vpop.f32.mrf.mxu1 }
 0x172   :  { %2343 = vst [vmem:[#allocation20_spill] sm:$0xff] %v1890_v13 }
 0x173   :  { %1347 = vmatmul.msk.bf16.gmra.mxu2 %vm365_vm11, %v1726_v17 }
 0x174   :  { %1339 = vmatmul.msk.bf16.gmra.mxu1 %vm365_vm11, %v1726_v17 }
 0x176   :  { %v1896_v14 = vpop.f32.mrf.mxu2 }
 0x177   :  { %v1898_v15 = vpop.f32.mrf.mxu0 }
 0x179   :  { %v1900_v16 = vpop.f32.mrf.mxu1 }
 0x17a   :  { %2344 = vst [vmem:[#allocation21_spill] sm:$0xff] %v1900_v16 }
 0x17e   :  { %v1902_v18 = vpop.f32.mrf.mxu2 }
 0x17f   :  { %v1904_v39 = vpop.f32.mrf.mxu0 }
 0x181   :  { %v1906_v19 = vpop.f32.mrf.mxu1 }
 0x182   :  { %2345 = vst [vmem:[#allocation22_spill] sm:$0xff] %v1906_v19 }
 0x183   :  { %1348 = vmatmul.msk.bf16.gmra.mxu2 %vm365_vm11, %v1749_v26 }
 0x184   :  { %1340 = vmatmul.msk.bf16.gmra.mxu1 %vm365_vm11, %v1749_v26 }
 0x186   :  { %v1912_v20 = vpop.f32.mrf.mxu2 }
 0x187   :  { %v1914_v57 = vpop.f32.mrf.mxu0 }
 0x189   :  { %v1916_v34 = vpop.f32.mrf.mxu1 }
 0x18a   :  { %2346 = vst [vmem:[#allocation23_spill] sm:$0xff] %v1916_v34 }
 0x18e   :  { %v1918_v35 = vpop.f32.mrf.mxu2 }
 0x18f   :  { %v1920_v38 = vpop.f32.mrf.mxu0 }
 0x191   :  { %v1922_v41 = vpop.f32.mrf.mxu1 }
 0x192   :  { %2347 = vst [vmem:[#allocation24_spill] sm:$0xff] %v1922_v41 }
 0x193   :  { %1349 = vmatmul.msk.bf16.gmra.mxu2 %vm365_vm11, %v1768_v37 }
 0x194   :  { %1341 = vmatmul.msk.bf16.gmra.mxu1 %vm365_vm11, %v1768_v37 }
 0x196   :  { %v1928_v36 = vpop.f32.mrf.mxu2 }
 0x197   :  { %v1930_v42 = vpop.f32.mrf.mxu0 }
 0x199   :  { %v1932_v46 = vpop.f32.mrf.mxu1 }
 0x19a   :  { %2348 = vst [vmem:[#allocation25_spill] sm:$0xff] %v1932_v46 }
 0x19e   :  { %v1934_v45 = vpop.f32.mrf.mxu2 }
 0x19f   :  { %v430_v48 = vpop.f32.mrf.mxu0 }
 0x1a1   :  { %v1936_v49 = vpop.f32.mrf.mxu1 }
 0x1a3   :  { %1350 = vmatmul.msk.bf16.gmra.mxu2 %vm365_vm11, %v1780_v47 }
 0x1a4   :  { %1342 = vmatmul.msk.bf16.gmra.mxu1 %vm365_vm11, %v1780_v47 }
 0x1a6   :  { %v1942_v50 = vpop.f32.mrf.mxu2 }
 0x1a7   :  { %v433_v29 = vpop.f32.mrf.mxu0 }
 0x1a9   :  { %v1944_v53 = vpop.f32.mrf.mxu1 }
 0x1ae   :  { %v1946_v54 = vpop.f32.mrf.mxu2 }
 0x1af   :  { %v435_v43 = vpop.f32.mrf.mxu0 }
 0x1b1   :  { %v1948_v55 = vpop.f32.mrf.mxu1 }
 0x1b3   :  { %1351 = vmatmul.msk.bf16.gmra.mxu2 %vm365_vm11, %v1794_v1 }
 0x1b4   :  { %1343 = vmatmul.msk.bf16.gmra.mxu1 %vm365_vm11, %v1794_v1 }
 0x1b6   :  { %v531_v60 = vpop.f32.mrf.mxu2 }
 0x1b7   :  { %v438_v30 = vpop.f32.mrf.mxu0 }
 0x1b9   :  { %v1954_v37 = vpop.f32.mrf.mxu1 }
 0x1be   :  { %v533_v47 = vpop.f32.mrf.mxu2 }
 0x1bf   :  { %v440_v26 = vpop.f32.mrf.mxu0 }
 0x1c1   :  { %v1956_v17 = vpop.f32.mrf.mxu1 }
 0x1c3   :  { %1352 = vmatmul.msk.bf16.gmra.mxu2 %vm365_vm11, %v1815_v7 }
 0x1c4   :  { %1344 = vmatmul.msk.bf16.gmra.mxu1 %vm365_vm11, %v1815_v7  ;;  %v441_v7 = vadd.f32 %v440_v26, %v1691_v10 }
 0x1c6   :  { %v536_v4 = vpop.f32.mrf.mxu2  ;;  %v585_v34 = vmax.f32 %v441_v7, 0.0 }
 0x1c7   :  { %v443_v56 = vpop.f32.mrf.mxu0 }
 0x1c8   :  { %v444_v62 = vadd.f32 %v443_v56, %v1667_v58 }
 0x1c9   :  { %v1962_v51 = vpop.f32.mrf.mxu1 }
 0x1ca   :  { %v588_v13 = vmax.f32 %v444_v62, 0.0 }
 0x1ce   :  { %v538_v52 = vpop.f32.mrf.mxu2 }
 0x1cf   :  { %v445_v1 = vpop.f32.mrf.mxu0  ;;  %v539_v7 = vadd.f32 %v538_v52, %v1691_v10  ;;  %v534_v52 = vadd.f32 %v533_v47, %v1719_v3  ;;  %v529_v47 = vadd.f32 %v1946_v54, %v1721_v5 }
 0x1d0   :  { %v446_v63 = vadd.f32 %v445_v1, %v1717_v2  ;;  %v439_v1 = vadd.f32 %v438_v30, %v1695_v12 }
 0x1d1   :  { %v1965_v59 = vpop.f32.mrf.mxu1 }
 0x1d2   :  { %v591_v8 = vmax.f32 %v446_v63, 0.0  ;;  %v436_v63 = vadd.f32 %v435_v43, %v1719_v3  ;;  %v582_v56 = vmax.f32 %v439_v1, 0.0  ;;  %v431_v43 = vadd.f32 %v430_v48, %v1721_v5 }
 0x1d3   :  { %1353 = vmatmul.msk.bf16.gmra.mxu2 %vm365_vm11, %v1860_v31 }
 0x1d4   :  { %652 = vmatpush.xpose.msra.mxu3 %v591_v8  ;;  %1345 = vmatmul.msk.bf16.gmra.mxu1 %vm365_vm11, %v1860_v31  ;;  %v579_v46 = vmax.f32 %v436_v63, 0.0  ;;  %v573_v63 = vmax.f32 %v431_v43, 0.0  ;;  %v419_v43 = vadd.f32 %v1898_v15, %v1753_v27  ;;  %v522_v15 = vadd.f32 %v1928_v36, %v1734_v22 }
 0x1d6   :  { %v541_v16 = vpop.f32.mrf.mxu2 }
 0x1d7   :  { %v542_v31 = vadd.f32 %v541_v16, %v1667_v58  ;;  %v537_v16 = vadd.f32 %v536_v4, %v1695_v12  ;;  %v532_v4 = vadd.f32 %v531_v60, %v1730_v21  ;;  %v527_v60 = vadd.f32 %v1942_v50, %v1732_v44 }
 0x1d8   :  { %653 = vmatpush.xpose.msra.mxu3 %v588_v13  ;;  %v434_v13 = vadd.f32 %v433_v29, %v1730_v21  ;;  %v429_v29 = vadd.f32 %v1930_v42, %v1732_v44  ;;  %v424_v42 = vadd.f32 %v1914_v57, %v1734_v22  ;;  %v558_v50 = vmax.f32 %v419_v43, 0.0 }
 0x1d9   :  { %v1973_v19 = vpop.f32.mrf.mxu1 }
 0x1da   :  { %v576_v30 = vmax.f32 %v434_v13, 0.0  ;;  %v570_v48 = vmax.f32 %v429_v29, 0.0  ;;  %v421_v13 = vadd.f32 %v1904_v39, %v1742_v24  ;;  %v524_v39 = vadd.f32 %v1934_v45, %v1740_v23 }
 0x1db   :  { %v566_v45 = vmax.f32 %v522_v15, 0.0 }
 0x1dc   :  { %654 = vmatpush.xpose.msra.mxu3 %v585_v34  ;;  %v590_v34 = vmax.f32 %v542_v31, 0.0  ;;  %v584_v31 = vmax.f32 %v537_v16, 0.0  ;;  %v572_v16 = vmax.f32 %v527_v60, 0.0  ;;  %v569_v29 = vmax.f32 %v524_v39, 0.0 }
 0x1de   :  { %v543_v41 = vpop.f32.mrf.mxu2 }
 0x1df   :  { %v544_v8 = vadd.f32 %v543_v41, %v1717_v2  ;;  %v587_v41 = vmax.f32 %v539_v7, 0.0  ;;  %v564_v7 = vmax.f32 %v424_v42, 0.0  ;;  %v409_v42 = vadd.f32 %v1870_v40, %v1757_v32 }
 0x1e0   :  { %655 = vmatpush.xpose.msra.mxu3 %v582_v56  ;;  %v581_v56 = vmax.f32 %v534_v52, 0.0  ;;  %v414_v52 = vadd.f32 %v1882_v6, %v1755_v28  ;;  %v517_v6 = vadd.f32 %v1912_v20, %v1753_v27  ;;  %v493_v20 = vadd.f32 %v1965_v59, %v1667_v58 }
 0x1e1   :  { %v593_v26 = vmax.f32 %v544_v8, 0.0  ;;  %v1979_v62 = vpop.f32.mrf.mxu1  ;;  %v512_v40 = vadd.f32 %v1896_v14, %v1755_v28  ;;  %v509_v59 = vadd.f32 %v1886_v9, %v1763_v33  ;;  %v507_v14 = vadd.f32 %v1880_v0, %v1757_v32 }
 0x1e2   :  { %v485_v9 = vadd.f32 %v1954_v37, %v1719_v3  ;;  %v2084_v37 = vld [vmem:[%s2311_s1] sm:$0x7] }
 0x1e3   :  { %1320 = vmatpush.xpose.msk.msrb.mxu0 %vm601_vm12, %v593_v26  ;;  %v554_v43 = vmax.f32 %v512_v40, 0.0  ;;  %v548_v15 = vmax.f32 %v507_v14, 0.0  ;;  %v2352_v40 = vld [vmem:[#allocation22_spill] sm:$0xff]  ;;  %v2354_v14 = vld [vmem:[#allocation20_spill] sm:$0xff] }
 0x1e4   :  { %656 = vmatpush.xpose.msra.mxu3 %v579_v46  ;;  %v426_v46 = vadd.f32 %v1920_v38, %v1740_v23  ;;  %v578_v38 = vmax.f32 %v532_v4, 0.0 }
 0x1e6   :  { %v567_v26 = vmax.f32 %v426_v46, 0.0  ;;  %v2014_v54 = vpop.f32.mrf.mxu2  ;;  %v411_v46 = vadd.f32 %v1872_v61, %v1763_v33  ;;  %v514_v61 = vadd.f32 %v1902_v18, %v1744_v25  ;;  %v490_v18 = vadd.f32 %v1962_v51, %v1691_v10 }
 0x1e7   :  { %1321 = vmatpush.xpose.msk.msrb.mxu0 %vm601_vm12, %v590_v34  ;;  %v575_v34 = vmax.f32 %v529_v47, 0.0  ;;  %v560_v47 = vmax.f32 %v517_v6, 0.0  ;;  %v2349_v6 = vld [vmem:[#allocation25_spill] sm:$0xff] }
 0x1e8   :  { %657 = vmatpush.xpose.msra.mxu3 %v576_v30  ;;  %v561_v30 = vmax.f32 %v421_v13, 0.0  ;;  %v586_v39 = vmax.f32 %v490_v18, 0.0 }
 0x1e9   :  { %v1987_v1 = vpop.f32.mrf.mxu1 }
 0x1eb   :  { %1322 = vmatpush.xpose.msk.msrb.mxu0 %vm601_vm12, %v587_v41  ;;  %v416_v41 = vadd.f32 %v1888_v11, %v1744_v25  ;;  %v519_v11 = vadd.f32 %v1918_v35, %v1742_v24  ;;  %v549_v35 = vmax.f32 %v411_v46, 0.0 }
 0x1ec   :  { %658 = vmatpush.xpose.msra.mxu3 %v573_v63 }
 0x1ed   :  { %v563_v36 = vmax.f32 %v519_v11, 0.0 }
 0x1ee   :  { %v2032_v4 = vpop.f32.mrf.mxu2 }
 0x1ef   :  { %1323 = vmatpush.xpose.msk.msrb.mxu0 %vm601_vm12, %v584_v31  ;;  %v555_v31 = vmax.f32 %v416_v41, 0.0 }
 0x1f0   :  { %659 = vmatpush.xpose.msra.mxu3 %v570_v48  ;;  %v552_v48 = vmax.f32 %v414_v52, 0.0  ;;  %v480_v52 = vadd.f32 %v1944_v53, %v1721_v5 }
 0x1f1   :  { %v1997_v8 = vpop.f32.mrf.mxu1 }
 0x1f2   :  { %v574_v46 = vmax.f32 %v480_v52, 0.0 }
 0x1f3   :  { %1324 = vmatpush.xpose.msk.msrb.mxu0 %vm601_vm12, %v581_v56 }
 0x1f4   :  { %660 = vmatpush.xpose.msra.mxu3 %v567_v26  ;;  %v495_v26 = vadd.f32 %v1973_v19, %v1717_v2  ;;  %v557_v19 = vmax.f32 %v514_v61, 0.0 }
 0x1f6   :  { %v592_v13 = vmax.f32 %v495_v26, 0.0 }
 0x1f7   :  { %1325 = vmatpush.xpose.msk.msrb.mxu0 %vm601_vm12, %v578_v38  ;;  %v546_v38 = vmax.f32 %v409_v42, 0.0 }
 0x1f8   :  { %661 = vmatpush.xpose.msra.mxu3 %v564_v7  ;;  %v2049_v7 = vpop.f32.mrf.mxu2 }
 0x1f9   :  { %v2009_v57 = vpop.f32.mrf.mxu1 }
 0x1fb   :  { %1326 = vmatpush.xpose.msk.msrb.mxu0 %vm601_vm12, %v575_v34  ;;  %v589_v34 = vmax.f32 %v493_v20, 0.0 }
 0x1fc   :  { %662 = vmatpush.xpose.msra.mxu3 %v561_v30  ;;  %v488_v30 = vadd.f32 %v1956_v17, %v1695_v12  ;;  %v483_v17 = vadd.f32 %v1948_v55, %v1730_v21  ;;  %v596_v55 = vperm.slane %v2084_v37, 0 }
 0x1ff   :  { %1327 = vmatpush.xpose.msk.msrb.mxu0 %vm601_vm12, %v572_v16  ;;  %v551_v16 = vmax.f32 %v509_v59, 0.0 }
 0x200   :  { %663 = vmatpush.xpose.msra.mxu3 %v558_v50  ;;  %v2067_v41 = vpop.f32.mrf.mxu2  ;;  %v583_v50 = vmax.f32 %v488_v30, 0.0 }
 0x201   :  { %v2023_v63 = vpop.f32.mrf.mxu1 }
 0x203   :  { %1328 = vmatpush.xpose.msk.msrb.mxu0 %vm601_vm12, %v569_v29  ;;  %v580_v29 = vmax.f32 %v485_v9, 0.0 }
 0x204   :  { %664 = vmatpush.xpose.msra.mxu3 %v555_v31  ;;  %v577_v31 = vmax.f32 %v483_v17, 0.0  ;;  %v2355_v17 = vld [vmem:[#allocation19_spill] sm:$0xff] }
 0x207   :  { %1329 = vmatpush.xpose.msk.msrb.mxu0 %vm601_vm12, %v566_v45  ;;  %v478_v45 = vadd.f32 %v1936_v49, %v1732_v44  ;;  %v2350_v49 = vld [vmem:[#allocation24_spill] sm:$0xff] }
 0x208   :  { %665 = vmatpush.xpose.msra.mxu3 %v552_v48  ;;  %v2079_v11 = vpop.f32.mrf.mxu2  ;;  %v598_v48 = vperm.slane %v2084_v37, 2  ;;  %v473_v26 = vadd.f32 %v2350_v49, %v1734_v22  ;;  %v597_v49 = vperm.slane %v2084_v37, 1 }
 0x209   :  { %v2037_v56 = vpop.f32.mrf.mxu1  ;;  %v571_v42 = vmax.f32 %v478_v45, 0.0 }
 0x20b   :  { %1330 = vmatpush.xpose.msk.msrb.mxu0 %vm601_vm12, %v563_v36  ;;  %v475_v36 = vadd.f32 %v2349_v6, %v1740_v23 }
 0x20c   :  { %666 = vmatpush.xpose.msra.mxu3 %v549_v35 }
 0x20d   :  { %v568_v61 = vmax.f32 %v475_v36, 0.0 }
 0x20f   :  { %1331 = vmatpush.xpose.msk.msrb.mxu0 %vm601_vm12, %v560_v47 }
 0x210   :  { %667 = vmatpush.xpose.msra.mxu3 %v546_v38  ;;  %v2099_v35 = vpop.f32.mrf.mxu2  ;;  %v2351_v38 = vld [vmem:[#allocation23_spill] sm:$0xff] }
 0x211   :  { %v2053_v60 = vpop.f32.mrf.mxu1  ;;  %v470_v20 = vadd.f32 %v2351_v38, %v1742_v24 }
 0x213   :  { %1332 = vmatpush.xpose.msk.msrb.mxu0 %vm601_vm12, %v557_v19  ;;  %668 = vmatmul.f32.vlgmr.msra.gmra.mxu3 %v596_v55  ;;  %v468_v19 = vadd.f32 %v2352_v40, %v1753_v27  ;;  %v562_v18 = vmax.f32 %v470_v20, 0.0  ;;  %v2358_v20 = vld [vmem:[#allocation13_spill] sm:$0xff] }
 0x214   :  { %672 = vmatpush.xpose.msrb.mxu3 %v592_v13  ;;  %v565_v13 = vmax.f32 %v473_v26, 0.0  ;;  %v2357_v26 = vld [vmem:[#allocation12_spill] sm:$0xff] }
 0x217   :  { %1333 = vmatpush.xpose.msk.msrb.mxu0 %vm601_vm12, %v554_v43  ;;  %v2353_v43 = vld [vmem:[#allocation21_spill] sm:$0xff] }
 0x218   :  { %673 = vmatpush.xpose.msrb.mxu3 %v589_v34  ;;  %v2107_v34 = vpop.f32.mrf.mxu2  ;;  %v465_v30 = vadd.f32 %v2353_v43, %v1744_v25 }
 0x219   :  { %v2065_v51 = vpop.f32.mrf.mxu1 }
 0x21a   :  { %v556_v9 = vmax.f32 %v465_v30, 0.0 }
 0x21b   :  { %1334 = vmatpush.xpose.msk.msrb.mxu0 %vm601_vm12, %v551_v16  ;;  %v463_v16 = vadd.f32 %v2354_v14, %v1755_v28  ;;  %v2362_v14 = vld [vmem:[#allocation5_spill] sm:$0xff] }
 0x21c   :  { %674 = vmatpush.xpose.msrb.mxu3 %v586_v39  ;;  %v559_v39 = vmax.f32 %v468_v19, 0.0  ;;  %v2360_v19 = vld [vmem:[#allocation15_spill] sm:$0xff] }
 0x21d   :  { %v553_v52 = vmax.f32 %v463_v16, 0.0 }
 0x21f   :  { %1335 = vmatpush.xpose.msk.msrb.mxu0 %vm601_vm12, %v548_v15 }
 0x220   :  { %675 = vmatpush.xpose.msrb.mxu3 %v583_v50  ;;  %v2113_v15 = vpop.f32.mrf.mxu2 }
 0x221   :  { %v2075_v0 = vpop.f32.mrf.mxu1 }
 0x222   :  { %1336 = vmatmul.msk.f32.vlgmr.msrb.gmra.mxu0 %vm601_vm12, %v598_v48 }
 0x224   :  { %676 = vmatpush.xpose.msrb.mxu3 %v580_v29  ;;  %v460_v29 = vadd.f32 %v2355_v17, %v1763_v33 }
 0x228   :  { %677 = vmatpush.xpose.msrb.mxu3 %v577_v31  ;;  %v2356_v31 = vld [vmem:[#allocation18_spill] sm:$0xff] }
 0x229   :  { %v2091_v53 = vpop.f32.mrf.mxu1  ;;  %v458_v45 = vadd.f32 %v2356_v31, %v1757_v32 }
 0x22b   :  { %v547_v36 = vmax.f32 %v458_v45, 0.0 }
 0x22c   :  { %678 = vmatpush.xpose.msrb.mxu3 %v574_v46  ;;  %v550_v46 = vmax.f32 %v460_v29, 0.0 }
 0x230   :  { %679 = vmatpush.xpose.msrb.mxu3 %v571_v42  ;;  %v2119_v42 = vpop.f32.mrf.mxu2 }
 0x231   :  { %v933_v47 = vpop.f32.mrf.mxu1 }
 0x234   :  { %680 = vmatpush.xpose.msrb.mxu3 %v568_v61  ;;  %v897_v61 = vsel %vm165_vm0, %v2357_v26, 0 }
 0x238   :  { %681 = vmatpush.xpose.msrb.mxu3 %v565_v13  ;;  %v2359_v13 = vld [vmem:[#allocation10_spill] sm:$0xff]  ;;  %v2132_v30 = vpop.f32.mrf.mxu2 }
 0x239   :  { %v935_v59 = vpop.f32.mrf.mxu1  ;;  %v888_v40 = vsel %vm179_vm10, %v2359_v13, %v2358_v20 }
 0x23c   :  { %682 = vmatpush.xpose.msrb.mxu3 %v562_v18  ;;  %v2361_v18 = vld [vmem:[#allocation16_spill] sm:$0xff] }
 0x23d   :  { %v864_v43 = vsel %vm179_vm10, %v2361_v18, %v2360_v19  ;;  %v926_v18 = vadd.f32 %v2065_v51, %v1740_v23 }
 0x240   :  { %683 = vmatpush.xpose.msrb.mxu3 %v559_v39  ;;  %v2138_v29 = vpop.f32.mrf.mxu2 }
 0x241   :  { %v938_v50 = vpop.f32.mrf.mxu1 }
 0x242   :  { %v939_v45 = vadd.f32 %v938_v50, %v1695_v12  ;;  %v929_v50 = vadd.f32 %v2075_v0, %v1732_v44  ;;  %v921_v0 = vadd.f32 %v2037_v56, %v1742_v24 }
 0x244   :  { %684 = vmatpush.xpose.msrb.mxu3 %v556_v9  ;;  %v1082_v26 = vmax.f32 %v939_v45, 0.0  ;;  %v1061_v51 = vmax.f32 %v921_v0, 0.0  ;;  %v2365_v45 = vld [vmem:[#allocation8_spill] sm:$0xff] }
 0x248   :  { %685 = vmatpush.xpose.msrb.mxu3 %v553_v52  ;;  %v984_v20 = vpop.f32.mrf.mxu2 }
 0x249   :  { %v940_v6 = vpop.f32.mrf.mxu1 }
 0x24a   :  { %v941_v52 = vadd.f32 %v940_v6, %v1691_v10  ;;  %v931_v6 = vadd.f32 %v2091_v53, %v1721_v5  ;;  %v1067_v53 = vmax.f32 %v926_v18, 0.0 }
 0x24c   :  { %686 = vmatpush.xpose.msrb.mxu3 %v550_v46  ;;  %v1085_v46 = vmax.f32 %v941_v52, 0.0  ;;  %v1073_v19 = vmax.f32 %v931_v6, 0.0 }
 0x250   :  { %687 = vmatpush.xpose.msrb.mxu3 %v547_v36  ;;  %v936_v36 = vadd.f32 %v935_v59, %v1719_v3  ;;  %v987_v59 = vpop.f32.mrf.mxu2 }
 0x251   :  { %v943_v38 = vpop.f32.mrf.mxu1 }
 0x252   :  { %v944_v9 = vadd.f32 %v943_v38, %v1667_v58  ;;  %v934_v38 = vadd.f32 %v933_v47, %v1730_v21  ;;  %v1079_v13 = vmax.f32 %v936_v36, 0.0  ;;  %v924_v47 = vadd.f32 %v2053_v60, %v1734_v22 }
 0x253   :  { %688 = vmatmul.f32.vlgmr.msrb.gmra.mxu3 %v597_v49  ;;  %v914_v60 = vadd.f32 %v1997_v8, %v1755_v28  ;;  %v2366_v8 = vld [vmem:[#allocation9_spill] sm:$0xff] }
 0x254   :  { %1002 = vmatpush.bf16.msra.mxu3 %v897_v61  ;;  %v1088_v31 = vmax.f32 %v944_v9, 0.0  ;;  %v2363_v61 = vld [vmem:[#allocation6_spill] sm:$0xff]  ;;  %v919_v9 = vadd.f32 %v2023_v63, %v1753_v27 }
 0x255   :  { %v1052_v63 = vmax.f32 %v914_v60, 0.0  ;;  %v960_v60 = vadd.f32 %v2032_v4, %v1763_v33 }
 0x256   :  { %v1058_v52 = vmax.f32 %v919_v9, 0.0  ;;  %v2368_v9 = vld [vmem:[#allocation14_spill] sm:$0xff] }
 0x258   :  { %1003 = vmatpush.bf16.msra.mxu3 %v888_v40  ;;  %v1076_v40 = vmax.f32 %v934_v38, 0.0 }
 0x259   :  { %v945_v39 = vpop.f32.mrf.mxu1 }
 0x25a   :  { %v946_v16 = vadd.f32 %v945_v39, %v1717_v2  ;;  %v2364_v39 = vld [vmem:[#allocation7_spill] sm:$0xff] }
 0x25c   :  { %1004 = vmatpush.bf16.msra.mxu3 %v864_v43  ;;  %v1091_v17 = vmax.f32 %v946_v16, 0.0  ;;  %v1070_v43 = vmax.f32 %v929_v50, 0.0  ;;  %v1064_v16 = vmax.f32 %v924_v47, 0.0  ;;  %v2367_v47 = vld [vmem:[#allocation11_spill] sm:$0xff] }
 0x25e   :  { %1142 = vmatpush.xpose.msra.mxu0 %v1091_v17  ;;  %v916_v17 = vadd.f32 %v2009_v57, %v1744_v25  ;;  %v909_v57 = vadd.f32 %v1979_v62, %v1757_v32  ;;  %v988_v62 = vadd.f32 %v987_v59, %v1695_v12  ;;  %v978_v59 = vadd.f32 %v2119_v42, %v1732_v44 }
 0x25f   :  { %1354 = vmatmul.msk.bf16.vlgmr.msra.gmra.mxu3 %vm365_vm11, %v2362_v14  ;;  %v989_v14 = vpop.f32.mrf.mxu2  ;;  %v968_v42 = vadd.f32 %v2079_v11, %v1753_v27 }
 0x260   :  { %v1055_v56 = vmax.f32 %v916_v17, 0.0  ;;  %v1046_v38 = vmax.f32 %v909_v57, 0.0  ;;  %v1083_v18 = vmax.f32 %v988_v62, 0.0  ;;  %v1071_v0 = vmax.f32 %v978_v59, 0.0 }
 0x262   :  { %1143 = vmatpush.xpose.msra.mxu0 %v1088_v31 }
 0x266   :  { %1144 = vmatpush.xpose.msra.mxu0 %v1085_v46  ;;  %v911_v46 = vadd.f32 %v1987_v1, %v1763_v33  ;;  %v990_v1 = vadd.f32 %v989_v14, %v1691_v10 }
 0x267   :  { %v992_v31 = vpop.f32.mrf.mxu2 }
 0x268   :  { %v1086_v50 = vmax.f32 %v990_v1, 0.0 }
 0x26a   :  { %1145 = vmatpush.xpose.msra.mxu0 %v1082_v26  ;;  %v1049_v26 = vmax.f32 %v911_v46, 0.0 }
 0x26e   :  { %1146 = vmatpush.xpose.msra.mxu0 %v1079_v13  ;;  %v993_v13 = vadd.f32 %v992_v31, %v1667_v58 }
 0x26f   :  { %1355 = vmatmul.msk.bf16.gmra.mxu3 %vm365_vm11, %v2363_v61  ;;  %v994_v36 = vpop.f32.mrf.mxu2 }
 0x270   :  { %v995_v61 = vadd.f32 %v994_v36, %v1717_v2 }
 0x272   :  { %1147 = vmatpush.xpose.msra.mxu0 %v1076_v40  ;;  %v1092_v6 = vmax.f32 %v995_v61, 0.0  ;;  %v1089_v40 = vmax.f32 %v993_v13, 0.0 }
 0x276   :  { %1148 = vmatpush.xpose.msra.mxu0 %v1073_v19  ;;  %v985_v19 = vadd.f32 %v984_v20, %v1719_v3  ;;  %v975_v20 = vadd.f32 %v2113_v15, %v1740_v23  ;;  %v965_v15 = vadd.f32 %v2067_v41, %v1744_v25  ;;  %v1050_v41 = vmax.f32 %v960_v60, 0.0 }
 0x278   :  { %v1056_v31 = vmax.f32 %v965_v15, 0.0 }
 0x27a   :  { %1149 = vmatpush.xpose.msra.mxu0 %v1070_v43  ;;  %v983_v43 = vadd.f32 %v2138_v29, %v1730_v21  ;;  %v973_v29 = vadd.f32 %v2107_v34, %v1734_v22  ;;  %v963_v34 = vadd.f32 %v2049_v7, %v1755_v28 }
 0x27c   :  { %v1053_v11 = vmax.f32 %v963_v34, 0.0 }
 0x27e   :  { %1150 = vmatpush.xpose.msra.mxu0 %v1067_v53  ;;  %v1077_v53 = vmax.f32 %v983_v43, 0.0 }
 0x27f   :  { %1356 = vmatmul.msk.bf16.gmra.mxu3 %vm365_vm11, %v2364_v39  ;;  %v1080_v39 = vmax.f32 %v985_v19, 0.0 }
 0x282   :  { %1151 = vmatpush.xpose.msra.mxu0 %v1064_v16  ;;  %v1068_v16 = vmax.f32 %v975_v20, 0.0 }
 0x286   :  { %1152 = vmatpush.xpose.msra.mxu0 %v1061_v51  ;;  %v1065_v51 = vmax.f32 %v973_v29, 0.0 }
 0x28a   :  { %1153 = vmatpush.xpose.msra.mxu0 %v1058_v52  ;;  %v1059_v52 = vmax.f32 %v968_v42, 0.0  ;;  %v1218_v42 = vld [vmem:[%s2314_s4 + $0x58] sm:$0xff] }
 0x28e   :  { %1154 = vmatpush.xpose.msra.mxu0 %v1055_v56  ;;  %v958_v56 = vadd.f32 %v2014_v54, %v1757_v32 }
 0x28f   :  { %1357 = vmatmul.msk.bf16.gmra.mxu3 %vm365_vm11, %v2365_v45  ;;  %v2369_v45 = vld [vmem:[#allocation17_spill] sm:$0xff] }
 0x290   :  { %v1047_v7 = vmax.f32 %v958_v56, 0.0 }
 0x292   :  { %1155 = vmatpush.xpose.msra.mxu0 %v1052_v63 }
 0x296   :  { %1156 = vmatpush.xpose.msra.mxu0 %v1049_v26 }
 0x29a   :  { %1157 = vmatpush.xpose.msra.mxu0 %v1046_v38 }
 0x29d   :  { %1158 = vmatmul.f32.vlgmr.msra.gmra.mxu0 %v596_v55  ;;  %v980_v55 = vadd.f32 %v2132_v30, %v1721_v5  ;;  %v970_v30 = vadd.f32 %v2099_v35, %v1742_v24  ;;  %v669_v35 = vpop.f32.mrf.mxu3 }
 0x29e   :  { %1162 = vmatpush.xpose.msrb.mxu0 %v1092_v6 }
 0x29f   :  { %1358 = vmatmul.msk.bf16.gmra.mxu3 %vm365_vm11, %v2366_v8  ;;  %v1074_v14 = vmax.f32 %v980_v55, 0.0  ;;  %v1062_v17 = vmax.f32 %v970_v30, 0.0  ;;  %v1221_v30 = vld [vmem:[%s2314_s4 + $0x70] sm:$0xff] }
 0x2a2   :  { %1163 = vmatpush.xpose.msrb.mxu0 %v1089_v40 }
 0x2a6   :  { %1164 = vmatpush.xpose.msrb.mxu0 %v1086_v50 }
 0x2aa   :  { %1165 = vmatpush.xpose.msrb.mxu0 %v1083_v18 }
 0x2ae   :  { %1166 = vmatpush.xpose.msrb.mxu0 %v1080_v39 }
 0x2af   :  { %1359 = vmatmul.msk.bf16.gmra.mxu3 %vm365_vm11, %v2367_v47 }
 0x2b2   :  { %1167 = vmatpush.xpose.msrb.mxu0 %v1077_v53 }
 0x2b6   :  { %1168 = vmatpush.xpose.msrb.mxu0 %v1074_v14 }
 0x2ba   :  { %1169 = vmatpush.xpose.msrb.mxu0 %v1071_v0 }
 0x2be   :  { %1170 = vmatpush.xpose.msrb.mxu0 %v1068_v16 }
 0x2bf   :  { %1360 = vmatmul.msk.bf16.gmra.mxu3 %vm365_vm11, %v2368_v9 }
 0x2c2   :  { %1171 = vmatpush.xpose.msrb.mxu0 %v1065_v51 }
 0x2c6   :  { %1172 = vmatpush.xpose.msrb.mxu0 %v1062_v17 }
 0x2ca   :  { %1173 = vmatpush.xpose.msrb.mxu0 %v1059_v52  ;;  %v1216_v52 = vld [vmem:[%s2314_s4 + $0x48] sm:$0xff] }
 0x2ce   :  { %1174 = vmatpush.xpose.msrb.mxu0 %v1056_v31 }
 0x2cf   :  { %1361 = vmatmul.msk.bf16.gmra.mxu3 %vm365_vm11, %v2369_v45  ;;  %v1214_v45 = vld [vmem:[%s2314_s4 + $0x38] sm:$0xff] }
 0x2d2   :  { %1175 = vmatpush.xpose.msrb.mxu0 %v1053_v11  ;;  %v1212_v11 = vld [vmem:[%s2314_s4 + $0x28] sm:$0xff] }
 0x2d6   :  { %v689_v46 = vpop.f32.mrf.mxu3  ;;  %1176 = vmatpush.xpose.msrb.mxu0 %v1050_v41 }
 0x2d7   :  { %v2207_v63 = vadd.f32 %v689_v46, %v669_v35  ;;  %v1210_v46 = vld [vmem:[%s2314_s4 + $0x18] sm:$0xff] }
 0x2da   :  { %1177 = vmatpush.xpose.msrb.mxu0 %v1047_v7 }
 0x2dd   :  { %1178 = vmatmul.f32.vlgmr.msrb.gmra.mxu0 %v597_v49 }
 0x2e2   :  { %v2211_v36 = vpop.f32.mrf.mxu3 }
 0x2e3   :  { %v1007_v7 = vadd.f32 %v2211_v36, %v1757_v32  ;;  %v1208_v32 = vld [vmem:[%s2314_s4 + $0x8] sm:$0xff]  ;;  %v1207_v36 = vld [vmem:[%s2314_s4] sm:$0xff] }
 0x2ea   :  { %v2213_v57 = vpop.f32.mrf.mxu3 }
 0x2eb   :  { %v1009_v56 = vadd.f32 %v2213_v57, %v1763_v33  ;;  %v1048_v33 = vmax.f32 %v1007_v7, 0.0  ;;  %v1209_v57 = vld [vmem:[%s2314_s4 + $0x10] sm:$0xff] }
 0x2f2   :  { %v2215_v4 = vpop.f32.mrf.mxu3 }
 0x2f3   :  { %v1012_v35 = vadd.f32 %v2215_v4, %v1755_v28  ;;  %v1211_v28 = vld [vmem:[%s2314_s4 + $0x20] sm:$0xff]  ;;  %v1051_v4 = vmax.f32 %v1009_v56, 0.0 }
 0x2f5   :  { %v1054_v41 = vmax.f32 %v1012_v35, 0.0 }
 0x2fa   :  { %v1013_v26 = vpop.f32.mrf.mxu3 }
 0x2fb   :  { %v1014_v34 = vadd.f32 %v1013_v26, %v1744_v25  ;;  %v1213_v25 = vld [vmem:[%s2314_s4 + $0x30] sm:$0xff]  ;;  %v709_v26 = vpop.f32.mrf.mxu0 }
 0x2fd   :  { %v1057_v60 = vmax.f32 %v1014_v34, 0.0 }
 0x302   :  { %v1016_v61 = vpop.f32.mrf.mxu3 }
 0x303   :  { %v1017_v17 = vadd.f32 %v1016_v61, %v1753_v27  ;;  %v1215_v27 = vld [vmem:[%s2314_s4 + $0x40] sm:$0xff] }
 0x305   :  { %v1060_v31 = vmax.f32 %v1017_v17, 0.0 }
 0x30a   :  { %v1018_v38 = vpop.f32.mrf.mxu3 }
 0x312   :  { %v1021_v54 = vpop.f32.mrf.mxu3 }
 0x31a   :  { %v1023_v13 = vpop.f32.mrf.mxu3  ;;  %v1159_v61 = vpop.f32.mrf.mxu0 }
 0x322   :  { %v1026_v6 = vpop.f32.mrf.mxu3 }
 0x32a   :  { %v1028_v8 = vpop.f32.mrf.mxu3 }
 0x332   :  { %v1031_v1 = vpop.f32.mrf.mxu3 }
 0x33a   :  { %v1033_v40 = vpop.f32.mrf.mxu3 }
 0x33b   :  { %v1034_v14 = vadd.f32 %v1033_v40, %v1719_v3  ;;  %v1024_v3 = vadd.f32 %v1023_v13, %v1740_v23  ;;  %v1019_v23 = vadd.f32 %v1018_v38, %v1742_v24  ;;  %v1217_v24 = vld [vmem:[%s2314_s4 + $0x50] sm:$0xff]  ;;  %v710_v13 = vadd.f32 %v709_v26, %v2207_v63 }
 0x33d   :  { %v1069_v9 = vmax.f32 %v1024_v3, 0.0  ;;  %v1063_v15 = vmax.f32 %v1019_v23, 0.0 }
 0x342   :  { %v1036_v62 = vpop.f32.mrf.mxu3 }
 0x343   :  { %v1037_v53 = vadd.f32 %v1036_v62, %v1695_v12  ;;  %v1027_v12 = vadd.f32 %v1026_v6, %v1732_v44  ;;  %v1220_v44 = vld [vmem:[%s2314_s4 + $0x68] sm:$0xff] }
 0x345   :  { %v1084_v20 = vmax.f32 %v1037_v53, 0.0  ;;  %v1072_v16 = vmax.f32 %v1027_v12, 0.0 }
 0x34a   :  { %v1038_v50 = vpop.f32.mrf.mxu3 }
 0x34b   :  { %v1039_v47 = vadd.f32 %v1038_v50, %v1691_v10  ;;  %v1029_v10 = vadd.f32 %v1028_v8, %v1721_v5  ;;  %v1222_v5 = vld [vmem:[%s2314_s4 + $0x78] sm:$0xff] }
 0x34c   :  { %1227 = vmatpush.msra.mxu2 %v1222_v5 }
 0x34d   :  { %v1087_v59 = vmax.f32 %v1039_v47, 0.0  ;;  %v1075_v29 = vmax.f32 %v1029_v10, 0.0 }
 0x34e   :  { %1228 = vmatpush.msra.mxu2 %v1221_v30 }
 0x350   :  { %1229 = vmatpush.msra.mxu2 %v1220_v44 }
 0x352   :  { %v1041_v19 = vpop.f32.mrf.mxu3 }
 0x353   :  { %v1042_v43 = vadd.f32 %v1041_v19, %v1667_v58  ;;  %v1032_v58 = vadd.f32 %v1031_v1, %v1730_v21  ;;  %v1022_v21 = vadd.f32 %v1021_v54, %v1734_v22  ;;  %v1219_v22 = vld [vmem:[%s2314_s4 + $0x60] sm:$0xff] }
 0x354   :  { %1230 = vmatpush.msra.mxu2 %v1219_v22  ;;  %v1400_v1 = vld [vmem:[%s2315_s5] ss:$0 sm:$0xff] }
 0x355   :  { %v1090_v55 = vmax.f32 %v1042_v43, 0.0  ;;  %v1078_v0 = vmax.f32 %v1032_v58, 0.0  ;;  %v1066_v51 = vmax.f32 %v1022_v21, 0.0 }
 0x356   :  { %1231 = vmatpush.msra.mxu2 %v1218_v42 }
 0x358   :  { %1232 = vmatpush.msra.mxu2 %v1217_v24 }
 0x35a   :  { %v1043_v18 = vpop.f32.mrf.mxu3  ;;  %1233 = vmatpush.msra.mxu2 %v1216_v52  ;;  %v1179_v37 = vpop.f32.mrf.mxu0 }
 0x35b   :  { %v1044_v49 = vadd.f32 %v1043_v18, %v1717_v2  ;;  %v1081_v2 = vmax.f32 %v1034_v14, 0.0  ;;  %v1180_v38 = vadd.f32 %v1179_v37, %v1159_v61 }
 0x35c   :  { %1234 = vmatpush.msra.mxu2 %v1215_v27 }
 0x35d   :  { %v1093_v39 = vmax.f32 %v1044_v49, 0.0 }
 0x35e   :  { %1235 = vmatpush.msra.mxu2 %v1214_v45 }
 0x35f   :  { %1362 = vmatpush.xpose.msk.msra.mxu1 %vm601_vm12, %v1093_v39 }
 0x360   :  { %1236 = vmatpush.msra.mxu2 %v1213_v25 }
 0x362   :  { %1237 = vmatpush.msra.mxu2 %v1212_v11 }
 0x363   :  { %1363 = vmatpush.xpose.msk.msra.mxu1 %vm601_vm12, %v1090_v55 }
 0x364   :  { %1238 = vmatpush.msra.mxu2 %v1211_v28 }
 0x366   :  { %1239 = vmatpush.msra.mxu2 %v1210_v46 }
 0x367   :  { %1364 = vmatpush.xpose.msk.msra.mxu1 %vm601_vm12, %v1087_v59 }
 0x368   :  { %1240 = vmatpush.msra.mxu2 %v1209_v57 }
 0x36a   :  { %1241 = vmatpush.msra.mxu2 %v1208_v32 }
 0x36b   :  { %1365 = vmatpush.xpose.msk.msra.mxu1 %vm601_vm12, %v1084_v20 }
 0x36c   :  { %1242 = vmatpush.msra.mxu2 %v1207_v36 }
 0x36f   :  { %1366 = vmatpush.xpose.msk.msra.mxu1 %vm601_vm12, %v1081_v2 }
 0x373   :  { %1367 = vmatpush.xpose.msk.msra.mxu1 %vm601_vm12, %v1078_v0 }
 0x377   :  { %1368 = vmatpush.xpose.msk.msra.mxu1 %vm601_vm12, %v1075_v29 }
 0x37b   :  { %1369 = vmatpush.xpose.msk.msra.mxu1 %vm601_vm12, %v1072_v16 }
 0x37f   :  { %1370 = vmatpush.xpose.msk.msra.mxu1 %vm601_vm12, %v1069_v9 }
 0x383   :  { %1371 = vmatpush.xpose.msk.msra.mxu1 %vm601_vm12, %v1066_v51 }
 0x387   :  { %1372 = vmatpush.xpose.msk.msra.mxu1 %vm601_vm12, %v1063_v15 }
 0x38b   :  { %1373 = vmatpush.xpose.msk.msra.mxu1 %vm601_vm12, %v1060_v31 }
 0x38f   :  { %1374 = vmatpush.xpose.msk.msra.mxu1 %vm601_vm12, %v1057_v60 }
 0x393   :  { %1375 = vmatpush.xpose.msk.msra.mxu1 %vm601_vm12, %v1054_v41 }
 0x397   :  { %1376 = vmatpush.xpose.msk.msra.mxu1 %vm601_vm12, %v1051_v4 }
 0x39b   :  { %1377 = vmatpush.xpose.msk.msra.mxu1 %vm601_vm12, %v1048_v33 }
 0x39e   :  { %1378 = vmatmul.msk.f32.vlgmr.msra.gmra.mxu1 %vm601_vm12, %v598_v48 }
 0x41b   :  { %v1199_v48 = vpop.f32.mrf.mxu1 }
 0x41c   :  { %v1200_v54 = vadd.f32 %v1199_v48, %v1180_v38 }
 0x41e   :  { %v1203_v6 = vrot.slane %v1200_v54, 7 }
 0x420   :  { %v1206_v8 = vsel %vm1205_vm13, %v710_v13, %v1203_v6 }
 0x421   :  { %1243 = vmatmul.f32.vlgmr.msra.gmra.mxu2 %v1206_v8 }
 0x4a4   :  { %v1244_v40 = vpop.f32.mrf.mxu2 }
 0x4a5   :  { %v1245_v62 = vadd.f32 %v1400_v1, %v1244_v40 }
 0x4a7   :  { %1247 = vst [vmem:[#allocation2] sm:$0x3] %v1245_v62 }
 0x4a8   :  { %1258 = dma.vmem_to_hbm [thread:$0]  %s1254_s20, 32, %s1256_s22, [#allocation3]  }
 0x4a9   :  { %1425 = dma.done.wait [#allocation3], 32  }
 0x4aa   :  { %1426 = vsyncadd [#allocation3], 4294967264 }
 0x4ab   :  { %1263 = vsyncpa [#allocation3], 1 }

</bundles_post_ra>
